<compile_context>
chip_gen: v6e
topology: v6e:2x2x1
jax: 0.10.0
libtpu: 0.0.40
codegen_flags: <defaults>
</compile_context>

<pallas_src>
import math

import jax
import jax.numpy as jnp
from jax import lax
from jax.experimental import pallas as pl
from jax.experimental.pallas import tpu as pltpu


def _gelu(x, approx):
    if approx:
        # tanh approximation: tanh runs on the EUP slot (near-free on v6e/v7x).
        c = math.sqrt(2.0 / math.pi)
        return 0.5 * x * (1.0 + jnp.tanh(c * (x + 0.044715 * x * x * x)))
    # PyTorch F.gelu default = exact erf-based GELU.
    return 0.5 * x * (1.0 + lax.erf(x * (1.0 / math.sqrt(2.0))))


def make_san_kernel(r_valid, chunk_bounds, gelu_approx):
    """Kernel factory; statics (valid-region count, R-chunking, gelu flavor)
    are closed over so everything inside the kernel stays static."""

    def san_kernel(vi_ref, vq_ref, w_img_ref, w_q_ref, b_sum_ref, w_att_ref,
                   out_ref):
        TB, Rp, D = vi_ref.shape
        K = w_img_ref.shape[1]

        vq_f32 = vq_ref[...].astype(jnp.float32)          # (TB, D) exact residual
        w_img = w_img_ref[...]                            # (D, K) compute dtype
        w_att = w_att_ref[...].reshape(1, 1, K)           # f32

        # hq = ff_ques(vq); fold BOTH biases (b_q + b_img) in here once so the
        # big (TB, rc, K) slab below needs no separate bias add.
        hq = jnp.dot(vq_f32.astype(w_q_ref.dtype), w_q_ref[...],
                     preferred_element_type=jnp.float32)  # (TB, K) f32
        hq_b = hq + b_sum_ref[...]                        # (TB, K) f32

        # ---- Pass 1: attention scores, R-chunked so live (TB, rc, K) f32
        # temporaries stay small.  Static slices on multiples of 8 -> zero-cost
        # views; the reshapes are layout no-ops (rc % 8 == 0).
        score_chunks = []
        for c0, c1 in chunk_bounds:
            rc = c1 - c0
            vi_c = vi_ref[:, c0:c1, :]                    # (TB, rc, D)
            hi = jnp.dot(vi_c.reshape(TB * rc, D), w_img,
                         preferred_element_type=jnp.float32)
            ha = _gelu(hi.reshape(TB, rc, K) + hq_b[:, None, :], gelu_approx)
            # TODO(synk): nn.Dropout(0.3) is identity in eval mode; training
            # RNG masking intentionally omitted.
            # b_att dropped: a per-row constant cancels exactly in the softmax.
            score_chunks.append(jnp.sum(ha * w_att, axis=-1))      # (TB, rc)
        scores = (score_chunks[0] if len(score_chunks) == 1
                  else jnp.concatenate(score_chunks, axis=-1))     # (TB, Rp)

        # Mask zero-padded region rows: gelu(hq_b) . w_att is nonzero there.
        if r_valid < Rp:
            col = lax.broadcasted_iota(jnp.int32, (TB, Rp), 1)
            scores = jnp.where(col < r_valid, scores, -jnp.inf)

        # Softmax over regions (lane axis; no lane-width-1 tensors anywhere).
        m = jnp.max(scores, axis=-1, keepdims=True)                # (TB, 1)
        e = jnp.exp(scores - m)                                    # (TB, Rp)
        denom = jnp.sum(e, axis=-1, keepdims=True)                 # (TB, 1)
        pi = e * pl.reciprocal(denom, approx=False)                # (TB, Rp) f32

        # ---- Pass 2: pi-weighted sum over vi (VPU mul + sublane reduce),
        # chunked so only a (TB, rc, D) f32 product is ever live.
        acc = jnp.zeros((TB, D), jnp.float32)
        for c0, c1 in chunk_bounds:
            vi_c = vi_ref[:, c0:c1, :]                    # (TB, rc, D)
            acc = acc + jnp.sum(pi[:, c0:c1, None] * vi_c, axis=1)

        out_ref[...] = acc + vq_f32                       # (TB, D) f32

    return san_kernel


def stacked_attention_forward(vi, vq, params, *, tb=16, r_chunk=64,
                              compute_dtype=jnp.bfloat16,
                              gelu_approx=False,
                              vmem_limit_bytes=None):
    """vi: [B, R, D], vq: [B, 1, D] -> u: [B, D] (float32).

    compute_dtype: dtype of the MXU matmul inputs (vi, w_img, w_q).  Default
    bf16 (2-3x MXU throughput, half the vi HBM traffic); pass jnp.float32 for
    exact PyTorch parity.  Accumulation and the "+ vq" residual are always f32.
    """
    B, R, D = vi.shape
    K = params["w_img"].shape[1]
    assert vq.shape == (B, 1, D)

    # --- batch tiling --------------------------------------------------------
    tb = min(tb, B)
    if tb >= 8:
        tb = (tb // 8) * 8
    # v7x has 2 TensorCores: keep >= 2 grid steps when the batch allows it.
    if B >= 16 and -(-B // tb) < 2:
        tb = max(8, ((B // 2) // 8) * 8)
    pad_b = (-B) % tb
    Bp = B + pad_b

    # --- region padding / chunking (sublane slices stay multiples of 8 so the
    # in-kernel reshapes never force a relayout copy) --------------------------
    Rp = ((R + 7) // 8) * 8
    rc = max(8, ((min(r_chunk, Rp) + 7) // 8) * 8)
    chunk_bounds = tuple((c0, min(c0 + rc, Rp)) for c0 in range(0, Rp, rc))

    vq2d = vq[:, 0, :].astype(jnp.float32)                  # (B, D), always f32
    if Rp != R:
        vi = jnp.pad(vi, ((0, 0), (0, Rp - R), (0, 0)))
    if pad_b:
        vi = jnp.pad(vi, ((0, pad_b), (0, 0), (0, 0)))
        vq2d = jnp.pad(vq2d, ((0, pad_b), (0, 0)))

    vi_in = vi.astype(compute_dtype)                        # (Bp, Rp, D)
    w_img = params["w_img"].astype(compute_dtype)           # (D, K)
    w_q = params["w_q"].astype(compute_dtype)               # (D, K)
    # One combined bias row; b_att dropped (softmax is shift-invariant).
    b_sum = (params["b_img"] + params["b_q"]).reshape(1, K).astype(jnp.float32)
    w_att_row = params["w_att"].reshape(1, K).astype(jnp.float32)

    if vmem_limit_bytes is None:
        cap = 64 * 1024 * 1024
        try:
            cap = int(pltpu.get_tpu_info().vmem_capacity_bytes)
        except Exception:
            pass
        # ~96 MiB on 128-MiB chips (v5e/v6e), ~48 MiB on v7x (64 MiB VMEM).
        vmem_limit_bytes = min((cap * 3) // 4, 100 * 1024 * 1024)

    kernel = make_san_kernel(R, chunk_bounds, gelu_approx)

    def build_call(single_buffer_consts):
        kw = {"pipeline_mode": pl.Buffered(1)} if single_buffer_consts else {}

        def const_spec(shape):
            zeros = (0,) * len(shape)
            return pl.BlockSpec(shape, lambda b: zeros, **kw)

        grid_spec = pltpu.PrefetchScalarGridSpec(
            num_scalar_prefetch=0,
            grid=(Bp // tb,),
            in_specs=[
                pl.BlockSpec((tb, Rp, D), lambda b: (b, 0, 0)),   # vi
                pl.BlockSpec((tb, D), lambda b: (b, 0)),          # vq (f32)
                const_spec((D, K)),                               # w_img
                const_spec((D, K)),                               # w_q
                const_spec((1, K)),                               # b_img + b_q
                const_spec((1, K)),                               # w_att row
            ],
            out_specs=pl.BlockSpec((tb, D), lambda b: (b, 0)),
        )
        return pl.pallas_call(
            kernel,
            out_shape=jax.ShapeDtypeStruct((Bp, D), jnp.float32),
            grid_spec=grid_spec,
            compiler_params=pltpu.CompilerParams(
                dimension_semantics=("parallel",),
                vmem_limit_bytes=vmem_limit_bytes),
        )

    try:
        out = build_call(True)(vi_in, vq2d, w_img, w_q, b_sum, w_att_row)
    except Exception:
        # Fallback for jax versions without BlockSpec(pipeline_mode=Buffered(1)).
        out = build_call(False)(vi_in, vq2d, w_img, w_q, b_sum, w_att_row)
    return out[:B]


def init_params(key, d, k):
    ks = jax.random.split(key, 6)
    bound_dk = 1.0 / math.sqrt(d)
    bound_k1 = 1.0 / math.sqrt(k)
    return {
        "w_img": jax.random.uniform(ks[0], (d, k), jnp.float32, -bound_dk, bound_dk),
        "b_img": jax.random.uniform(ks[1], (k,), jnp.float32, -bound_dk, bound_dk),
        "w_q":   jax.random.uniform(ks[2], (d, k), jnp.float32, -bound_dk, bound_dk),
        "b_q":   jax.random.uniform(ks[3], (k,), jnp.float32, -bound_dk, bound_dk),
        "w_att": jax.random.uniform(ks[4], (k, 1), jnp.float32, -bound_k1, bound_k1),
        "b_att": jax.random.uniform(ks[5], (1,), jnp.float32, -bound_k1, bound_k1),
    }


def reference_forward(vi, vq, params, mm_dtype=jnp.float32):
    """Pure-JAX reference.  mm_dtype rounds the matmul inputs (vi, vq, w_img,
    w_q) the same way the kernel does; the "+ vq" residual stays f32."""
    cast = lambda x: x.astype(mm_dtype).astype(jnp.float32)
    vi_mm = cast(vi)                                            # (B, R, D)
    vq2d = vq[:, 0, :].astype(jnp.float32)                      # (B, D)
    hi = vi_mm @ cast(params["w_img"]) + params["b_img"]        # (B, R, K)
    hq = cast(vq2d) @ cast(params["w_q"]) + params["b_q"]       # (B, K)
    ha = jax.nn.gelu(hi + hq[:, None, :], approximate=False)
    scores = (ha @ params["w_att"])[..., 0] + params["b_att"]   # (B, R)
    pi = jax.nn.softmax(scores, axis=1)
    vi_att = jnp.sum(pi[..., None] * vi_mm, axis=1)             # (B, D)
    return vi_att + vq2d


if __name__ == "__main__":
    # Make the pure-JAX references genuinely f32-accurate for the comparison.
    jax.config.update("jax_default_matmul_precision", "highest")

    key = jax.random.PRNGKey(0)
    k_vi, k_vq, k_p, k2 = jax.random.split(key, 4)

    # Config 1: small module-shaped problem (batch=2, regions=8, d=k=32).
    B, R, D, K = 2, 8, 32, 32
    vi = jax.random.normal(k_vi, (B, R, D), jnp.float32)
    vq = jax.random.normal(k_vq, (B, 1, D), jnp.float32)
    params = init_params(k_p, D, K)

    # Exact-f32 path (PyTorch forward semantics).
    out_f32 = jax.block_until_ready(
        stacked_attention_forward(vi, vq, params, compute_dtype=jnp.float32))
    ref_f32 = reference_forward(vi, vq, params)
    assert out_f32.shape == (B, D)
    assert jnp.allclose(out_f32, ref_f32, atol=1e-4, rtol=1e-4), "f32 mismatch"

    # Default bf16-MXU-input path vs a reference with identical input rounding.
    out_bf16 = jax.block_until_ready(stacked_attention_forward(vi, vq, params))
    ref_bf16 = reference_forward(vi, vq, params, mm_dtype=jnp.bfloat16)
    assert jnp.allclose(out_bf16, ref_bf16, atol=3e-3, rtol=3e-3), "bf16 mismatch"

    # Config 2: R not a multiple of 8 + multi-chunk path (region padding,
    # -inf score masking, lane-axis concat), checked tightly in f32.
    B2, R2 = 3, 22
    k_vi2, k_vq2 = jax.random.split(k2)
    vi2 = jax.random.normal(k_vi2, (B2, R2, D), jnp.float32)
    vq2 = jax.random.normal(k_vq2, (B2, 1, D), jnp.float32)
    out2 = jax.block_until_ready(
        stacked_attention_forward(vi2, vq2, params, r_chunk=8,
                                  compute_dtype=jnp.float32))
    ref2 = reference_forward(vi2, vq2, params)
    assert out2.shape == (B2, D)
    assert jnp.allclose(out2, ref2, atol=1e-4, rtol=1e-4), "chunked mismatch"

    print("KERNEL_OK")
</pallas_src>

<mosaic_0001>
module attributes {stable_mosaic.version = 11 : i64} {
  func.func @san_kernel(%arg0: i32, %arg1: memref<2x8x32xf32, #tpu.memory_space<vmem>>, %arg2: memref<2x32xf32, #tpu.memory_space<vmem>>, %arg3: memref<32x32xf32, #tpu.memory_space<vmem>>, %arg4: memref<32x32xf32, #tpu.memory_space<vmem>>, %arg5: memref<1x32xf32, #tpu.memory_space<vmem>>, %arg6: memref<1x32xf32, #tpu.memory_space<vmem>>, %arg7: memref<2x32xf32, #tpu.memory_space<vmem>>) attributes {dimension_semantics = [#tpu.dimension_semantics<parallel>], iteration_bounds = array<i64: 1>, scalar_prefetch = 0 : i64, scratch_operands = 0 : i64, tpu.core_type = #tpu.core_type<tc>, window_params = [{transform_indices = @transform_0, window_bounds = array<i64: 2, 8, 32>}, {transform_indices = @transform_1, window_bounds = array<i64: 2, 32>}, {pipeline_mode = #tpu.pipeline_mode<synchronous>, transform_indices = @transform_2, window_bounds = array<i64: 32, 32>}, {pipeline_mode = #tpu.pipeline_mode<synchronous>, transform_indices = @transform_3, window_bounds = array<i64: 32, 32>}, {pipeline_mode = #tpu.pipeline_mode<synchronous>, transform_indices = @transform_4, window_bounds = array<i64: 1, 32>}, {pipeline_mode = #tpu.pipeline_mode<synchronous>, transform_indices = @transform_5, window_bounds = array<i64: 1, 32>}, {transform_indices = @transform_6, window_bounds = array<i64: 2, 32>}]} {
    %c0 = arith.constant 0 : index
    %c0_0 = arith.constant 0 : index
    %0 = vector.load %arg2[%c0, %c0_0] : memref<2x32xf32, #tpu.memory_space<vmem>>, vector<2x32xf32>
    %c0_1 = arith.constant 0 : index
    %c0_2 = arith.constant 0 : index
    %1 = vector.load %arg3[%c0_1, %c0_2] : memref<32x32xf32, #tpu.memory_space<vmem>>, vector<32x32xf32>
    %c0_3 = arith.constant 0 : index
    %c0_4 = arith.constant 0 : index
    %2 = vector.load %arg6[%c0_3, %c0_4] : memref<1x32xf32, #tpu.memory_space<vmem>>, vector<1x32xf32>
    %3 = vector.shape_cast %2 : vector<1x32xf32> to vector<1x1x32xf32>
    %c0_5 = arith.constant 0 : index
    %c0_6 = arith.constant 0 : index
    %4 = vector.load %arg4[%c0_5, %c0_6] : memref<32x32xf32, #tpu.memory_space<vmem>>, vector<32x32xf32>
    %cst = arith.constant dense<0.000000e+00> : vector<2x32xf32>
    %5 = tpu.matmul %0, %4, %cst {dimension_numbers = #tpu.dot_dimension_numbers<[1], [0], [0], [1], [0, 0, 1, 1], [], []>, precision = #tpu.contract_precision<fp32>} : vector<2x32xf32>, vector<32x32xf32>, vector<2x32xf32> -> vector<2x32xf32>
    %c0_7 = arith.constant 0 : index
    %c0_8 = arith.constant 0 : index
    %6 = vector.load %arg5[%c0_7, %c0_8] : memref<1x32xf32, #tpu.memory_space<vmem>>, vector<1x32xf32>
    %7 = vector.broadcast %6 : vector<1x32xf32> to vector<2x32xf32>
    %8 = arith.addf %5, %7 : vector<2x32xf32>
    %c0_9 = arith.constant 0 : index
    %c0_10 = arith.constant 0 : index
    %c0_11 = arith.constant 0 : index
    %9 = vector.load %arg1[%c0_9, %c0_10, %c0_11] : memref<2x8x32xf32, #tpu.memory_space<vmem>>, vector<2x8x32xf32>
    %10 = vector.shape_cast %9 : vector<2x8x32xf32> to vector<16x32xf32>
    %cst_12 = arith.constant dense<0.000000e+00> : vector<16x32xf32>
    %11 = tpu.matmul %10, %1, %cst_12 {dimension_numbers = #tpu.dot_dimension_numbers<[1], [0], [0], [1], [0, 0, 1, 1], [], []>, precision = #tpu.contract_precision<fp32>} : vector<16x32xf32>, vector<32x32xf32>, vector<16x32xf32> -> vector<16x32xf32>
    %12 = vector.shape_cast %11 : vector<16x32xf32> to vector<2x8x32xf32>
    %13 = vector.shape_cast %8 : vector<2x32xf32> to vector<2x1x32xf32>
    %14 = vector.broadcast %13 : vector<2x1x32xf32> to vector<2x8x32xf32>
    %15 = arith.addf %12, %14 : vector<2x8x32xf32>
    %cst_13 = arith.constant 5.000000e-01 : f32
    %16 = vector.broadcast %cst_13 : f32 to vector<2x8x32xf32>
    %17 = arith.mulf %16, %15 : vector<2x8x32xf32>
    %cst_14 = arith.constant 0.707106769 : f32
    %18 = vector.broadcast %cst_14 : f32 to vector<2x8x32xf32>
    %19 = arith.mulf %15, %18 : vector<2x8x32xf32>
    %20 = math.erf %19 : vector<2x8x32xf32>
    %cst_15 = arith.constant 1.000000e+00 : f32
    %21 = vector.broadcast %cst_15 : f32 to vector<2x8x32xf32>
    %22 = arith.addf %21, %20 : vector<2x8x32xf32>
    %23 = arith.mulf %17, %22 : vector<2x8x32xf32>
    %24 = vector.broadcast %3 : vector<1x1x32xf32> to vector<2x8x32xf32>
    %25 = arith.mulf %23, %24 : vector<2x8x32xf32>
    %cst_16 = arith.constant dense<0.000000e+00> : vector<2x8xf32>
    %26 = vector.multi_reduction <add>, %25, %cst_16 [2] : vector<2x8x32xf32> to vector<2x8xf32>
    %cst_17 = arith.constant dense<0xFF800000> : vector<2xf32>
    %27 = vector.multi_reduction <maximumf>, %26, %cst_17 [1] : vector<2x8xf32> to vector<2xf32>
    %28 = vector.shape_cast %27 : vector<2xf32> to vector<2x1xf32>
    %29 = vector.broadcast %28 : vector<2x1xf32> to vector<2x8xf32>
    %30 = arith.subf %26, %29 : vector<2x8xf32>
    %31 = math.exp %30 : vector<2x8xf32>
    %cst_18 = arith.constant dense<0.000000e+00> : vector<2xf32>
    %32 = vector.multi_reduction <add>, %31, %cst_18 [1] : vector<2x8xf32> to vector<2xf32>
    %33 = vector.shape_cast %32 : vector<2xf32> to vector<2x1xf32>
    %34 = tpu.reciprocal %33 : vector<2x1xf32> -> vector<2x1xf32>
    %35 = vector.broadcast %34 : vector<2x1xf32> to vector<2x8xf32>
    %36 = arith.mulf %31, %35 : vector<2x8xf32>
    %cst_19 = arith.constant 0.000000e+00 : f32
    %37 = vector.broadcast %cst_19 : f32 to vector<2x32xf32>
    %c0_20 = arith.constant 0 : index
    %c0_21 = arith.constant 0 : index
    %c0_22 = arith.constant 0 : index
    %38 = vector.load %arg1[%c0_20, %c0_21, %c0_22] : memref<2x8x32xf32, #tpu.memory_space<vmem>>, vector<2x8x32xf32>
    %39 = vector.shape_cast %36 : vector<2x8xf32> to vector<2x8x1xf32>
    %40 = vector.broadcast %39 : vector<2x8x1xf32> to vector<2x8x32xf32>
    %41 = arith.mulf %40, %38 : vector<2x8x32xf32>
    %cst_23 = arith.constant dense<0.000000e+00> : vector<2x32xf32>
    %42 = vector.multi_reduction <add>, %41, %cst_23 [1] : vector<2x8x32xf32> to vector<2x32xf32>
    %43 = arith.addf %37, %42 : vector<2x32xf32>
    %44 = arith.addf %43, %0 : vector<2x32xf32>
    %c0_24 = arith.constant 0 : index
    %c0_25 = arith.constant 0 : index
    %45 = vector.load %arg7[%c0_24, %c0_25] : memref<2x32xf32, #tpu.memory_space<vmem>>, vector<2x32xf32>
    tpu.vector_store %arg7[%c0_24, %c0_25], %44 {strides = array<i32>} : memref<2x32xf32, #tpu.memory_space<vmem>>, vector<2x32xf32>,
    return
  }
  func.func @transform_0(%arg0: i32) -> (i32, i32, i32) {
    %c0_i32 = arith.constant 0 : i32
    %c0_i32_0 = arith.constant 0 : i32
    %c0_i32_1 = arith.constant 0 : i32
    return %arg0, %c0_i32, %c0_i32_0 : i32, i32, i32
  }
  func.func @transform_1(%arg0: i32) -> (i32, i32) {
    %c0_i32 = arith.constant 0 : i32
    %c0_i32_0 = arith.constant 0 : i32
    return %arg0, %c0_i32 : i32, i32
  }
  func.func @transform_2(%arg0: i32) -> (i32, i32) {
    %c0_i32 = arith.constant 0 : i32
    %c0_i32_0 = arith.constant 0 : i32
    %c0_i32_1 = arith.constant 0 : i32
    return %c0_i32, %c0_i32_0 : i32, i32
  }
  func.func @transform_3(%arg0: i32) -> (i32, i32) {
    %c0_i32 = arith.constant 0 : i32
    %c0_i32_0 = arith.constant 0 : i32
    %c0_i32_1 = arith.constant 0 : i32
    return %c0_i32, %c0_i32_0 : i32, i32
  }
  func.func @transform_4(%arg0: i32) -> (i32, i32) {
    %c0_i32 = arith.constant 0 : i32
    %c0_i32_0 = arith.constant 0 : i32
    %c0_i32_1 = arith.constant 0 : i32
    return %c0_i32, %c0_i32_0 : i32, i32
  }
  func.func @transform_5(%arg0: i32) -> (i32, i32) {
    %c0_i32 = arith.constant 0 : i32
    %c0_i32_0 = arith.constant 0 : i32
    %c0_i32_1 = arith.constant 0 : i32
    return %c0_i32, %c0_i32_0 : i32, i32
  }
  func.func @transform_6(%arg0: i32) -> (i32, i32) {
    %c0_i32 = arith.constant 0 : i32
    %c0_i32_0 = arith.constant 0 : i32
    return %arg0, %c0_i32 : i32, i32
  }
}

module attributes {stable_mosaic.version = 11 : i64} {
  func.func @san_kernel(%arg0: i32, %arg1: memref<2x8x32xf32, #tpu.memory_space<vmem>>, %arg2: memref<2x32xf32, #tpu.memory_space<vmem>>, %arg3: memref<32x32xf32, #tpu.memory_space<vmem>>, %arg4: memref<32x32xf32, #tpu.memory_space<vmem>>, %arg5: memref<1x32xf32, #tpu.memory_space<vmem>>, %arg6: memref<1x32xf32, #tpu.memory_space<vmem>>, %arg7: memref<2x32xf32, #tpu.memory_space<vmem>>) attributes {dimension_semantics = [#tpu.dimension_semantics<parallel>], iteration_bounds = array<i64: 1>, scalar_prefetch = 0 : i64, scratch_operands = 0 : i64, tpu.core_type = #tpu.core_type<tc>, window_params = [{transform_indices = @transform_0, window_bounds = array<i64: 2, 8, 32>}, {transform_indices = @transform_1, window_bounds = array<i64: 2, 32>}, {pipeline_mode = #tpu.pipeline_mode<synchronous>, transform_indices = @transform_2, window_bounds = array<i64: 32, 32>}, {pipeline_mode = #tpu.pipeline_mode<synchronous>, transform_indices = @transform_3, window_bounds = array<i64: 32, 32>}, {pipeline_mode = #tpu.pipeline_mode<synchronous>, transform_indices = @transform_4, window_bounds = array<i64: 1, 32>}, {pipeline_mode = #tpu.pipeline_mode<synchronous>, transform_indices = @transform_5, window_bounds = array<i64: 1, 32>}, {transform_indices = @transform_6, window_bounds = array<i64: 2, 32>}]} {
    %c0 = arith.constant 0 : index
    %c0_0 = arith.constant 0 : index
    %0 = vector.load %arg2[%c0, %c0_0] : memref<2x32xf32, #tpu.memory_space<vmem>>, vector<2x32xf32>
    %c0_1 = arith.constant 0 : index
    %c0_2 = arith.constant 0 : index
    %1 = vector.load %arg3[%c0_1, %c0_2] : memref<32x32xf32, #tpu.memory_space<vmem>>, vector<32x32xf32>
    %c0_3 = arith.constant 0 : index
    %c0_4 = arith.constant 0 : index
    %2 = vector.load %arg6[%c0_3, %c0_4] : memref<1x32xf32, #tpu.memory_space<vmem>>, vector<1x32xf32>
    %3 = vector.shape_cast %2 : vector<1x32xf32> to vector<1x1x32xf32>
    %c0_5 = arith.constant 0 : index
    %c0_6 = arith.constant 0 : index
    %4 = vector.load %arg4[%c0_5, %c0_6] : memref<32x32xf32, #tpu.memory_space<vmem>>, vector<32x32xf32>
    %cst = arith.constant dense<0.000000e+00> : vector<2x32xf32>
    %5 = tpu.matmul %0, %4, %cst {dimension_numbers = #tpu.dot_dimension_numbers<[1], [0], [0], [1], [0, 0, 1, 1], [], []>, precision = #tpu.contract_precision<fp32>} : vector<2x32xf32>, vector<32x32xf32>, vector<2x32xf32> -> vector<2x32xf32>
    %c0_7 = arith.constant 0 : index
    %c0_8 = arith.constant 0 : index
    %6 = vector.load %arg5[%c0_7, %c0_8] : memref<1x32xf32, #tpu.memory_space<vmem>>, vector<1x32xf32>
    %7 = vector.broadcast %6 : vector<1x32xf32> to vector<2x32xf32>
    %8 = arith.addf %5, %7 : vector<2x32xf32>
    %c0_9 = arith.constant 0 : index
    %c0_10 = arith.constant 0 : index
    %c0_11 = arith.constant 0 : index
    %9 = vector.load %arg1[%c0_9, %c0_10, %c0_11] : memref<2x8x32xf32, #tpu.memory_space<vmem>>, vector<2x8x32xf32>
    %10 = vector.shape_cast %9 : vector<2x8x32xf32> to vector<16x32xf32>
    %cst_12 = arith.constant dense<0.000000e+00> : vector<16x32xf32>
    %11 = tpu.matmul %10, %1, %cst_12 {dimension_numbers = #tpu.dot_dimension_numbers<[1], [0], [0], [1], [0, 0, 1, 1], [], []>, precision = #tpu.contract_precision<fp32>} : vector<16x32xf32>, vector<32x32xf32>, vector<16x32xf32> -> vector<16x32xf32>
    %12 = vector.shape_cast %11 : vector<16x32xf32> to vector<2x8x32xf32>
    %13 = vector.shape_cast %8 : vector<2x32xf32> to vector<2x1x32xf32>
    %14 = vector.broadcast %13 : vector<2x1x32xf32> to vector<2x8x32xf32>
    %15 = arith.addf %12, %14 : vector<2x8x32xf32>
    %cst_13 = arith.constant 5.000000e-01 : f32
    %16 = vector.broadcast %cst_13 : f32 to vector<2x8x32xf32>
    %17 = arith.mulf %16, %15 : vector<2x8x32xf32>
    %cst_14 = arith.constant 0.707106769 : f32
    %18 = vector.broadcast %cst_14 : f32 to vector<2x8x32xf32>
    %19 = arith.mulf %15, %18 : vector<2x8x32xf32>
    %20 = math.erf %19 : vector<2x8x32xf32>
    %cst_15 = arith.constant 1.000000e+00 : f32
    %21 = vector.broadcast %cst_15 : f32 to vector<2x8x32xf32>
    %22 = arith.addf %21, %20 : vector<2x8x32xf32>
    %23 = arith.mulf %17, %22 : vector<2x8x32xf32>
    %24 = vector.broadcast %3 : vector<1x1x32xf32> to vector<2x8x32xf32>
    %25 = arith.mulf %23, %24 : vector<2x8x32xf32>
    %cst_16 = arith.constant dense<0.000000e+00> : vector<2x8xf32>
    %26 = vector.multi_reduction <add>, %25, %cst_16 [2] : vector<2x8x32xf32> to vector<2x8xf32>
    %cst_17 = arith.constant dense<0xFF800000> : vector<2xf32>
    %27 = vector.multi_reduction <maximumf>, %26, %cst_17 [1] : vector<2x8xf32> to vector<2xf32>
    %28 = vector.shape_cast %27 : vector<2xf32> to vector<2x1xf32>
    %29 = vector.broadcast %28 : vector<2x1xf32> to vector<2x8xf32>
    %30 = arith.subf %26, %29 : vector<2x8xf32>
    %31 = math.exp %30 : vector<2x8xf32>
    %cst_18 = arith.constant dense<0.000000e+00> : vector<2xf32>
    %32 = vector.multi_reduction <add>, %31, %cst_18 [1] : vector<2x8xf32> to vector<2xf32>
    %33 = vector.shape_cast %32 : vector<2xf32> to vector<2x1xf32>
    %34 = tpu.reciprocal %33 : vector<2x1xf32> -> vector<2x1xf32>
    %35 = vector.broadcast %34 : vector<2x1xf32> to vector<2x8xf32>
    %36 = arith.mulf %31, %35 : vector<2x8xf32>
    %cst_19 = arith.constant 0.000000e+00 : f32
    %37 = vector.broadcast %cst_19 : f32 to vector<2x32xf32>
    %c0_20 = arith.constant 0 : index
    %c0_21 = arith.constant 0 : index
    %c0_22 = arith.constant 0 : index
    %38 = vector.load %arg1[%c0_20, %c0_21, %c0_22] : memref<2x8x32xf32, #tpu.memory_space<vmem>>, vector<2x8x32xf32>
    %39 = vector.shape_cast %36 : vector<2x8xf32> to vector<2x8x1xf32>
    %40 = vector.broadcast %39 : vector<2x8x1xf32> to vector<2x8x32xf32>
    %41 = arith.mulf %40, %38 : vector<2x8x32xf32>
    %cst_23 = arith.constant dense<0.000000e+00> : vector<2x32xf32>
    %42 = vector.multi_reduction <add>, %41, %cst_23 [1] : vector<2x8x32xf32> to vector<2x32xf32>
    %43 = arith.addf %37, %42 : vector<2x32xf32>
    %44 = arith.addf %43, %0 : vector<2x32xf32>
    %c0_24 = arith.constant 0 : index
    %c0_25 = arith.constant 0 : index
    %45 = vector.load %arg7[%c0_24, %c0_25] : memref<2x32xf32, #tpu.memory_space<vmem>>, vector<2x32xf32>
    tpu.vector_store %arg7[%c0_24, %c0_25], %44 {strides = array<i32>} : memref<2x32xf32, #tpu.memory_space<vmem>>, vector<2x32xf32>,
    return
  }
  func.func @transform_0(%arg0: i32) -> (i32, i32, i32) {
    %c0_i32 = arith.constant 0 : i32
    %c0_i32_0 = arith.constant 0 : i32
    %c0_i32_1 = arith.constant 0 : i32
    return %arg0, %c0_i32, %c0_i32_0 : i32, i32, i32
  }
  func.func @transform_1(%arg0: i32) -> (i32, i32) {
    %c0_i32 = arith.constant 0 : i32
    %c0_i32_0 = arith.constant 0 : i32
    return %arg0, %c0_i32 : i32, i32
  }
  func.func @transform_2(%arg0: i32) -> (i32, i32) {
    %c0_i32 = arith.constant 0 : i32
    %c0_i32_0 = arith.constant 0 : i32
    %c0_i32_1 = arith.constant 0 : i32
    return %c0_i32, %c0_i32_0 : i32, i32
  }
  func.func @transform_3(%arg0: i32) -> (i32, i32) {
    %c0_i32 = arith.constant 0 : i32
    %c0_i32_0 = arith.constant 0 : i32
    %c0_i32_1 = arith.constant 0 : i32
    return %c0_i32, %c0_i32_0 : i32, i32
  }
  func.func @transform_4(%arg0: i32) -> (i32, i32) {
    %c0_i32 = arith.constant 0 : i32
    %c0_i32_0 = arith.constant 0 : i32
    %c0_i32_1 = arith.constant 0 : i32
    return %c0_i32, %c0_i32_0 : i32, i32
  }
  func.func @transform_5(%arg0: i32) -> (i32, i32) {
    %c0_i32 = arith.constant 0 : i32
    %c0_i32_0 = arith.constant 0 : i32
    %c0_i32_1 = arith.constant 0 : i32
    return %c0_i32, %c0_i32_0 : i32, i32
  }
  func.func @transform_6(%arg0: i32) -> (i32, i32) {
    %c0_i32 = arith.constant 0 : i32
    %c0_i32_0 = arith.constant 0 : i32
    return %arg0, %c0_i32 : i32, i32
  }
}

</mosaic_0001>

<bundles_post_ra>
// kernel: tpu_custom_call.1
= control target key start
LH: loop header
LB: loop body
LE: loop exit
PB: predicated region body
PF: predicated region fallthrough
CT: control target
= control target key end

     0   :  { %11 = vsyncpa [#allocation3], 0  ;;  %s1921_s0 = inlined_call_operand.hbm [shape: f32[2,8,32], index: 0, kind: input, shape index: {}]   ;;  %s1922_s1 = inlined_call_operand.hbm [shape: f32[2,32], index: 1, kind: input, shape index: {}]   ;;  %s1923_s2 = inlined_call_operand.hbm [shape: f32[32,32], index: 2, kind: input, shape index: {}]   ;;  %s1924_s3 = inlined_call_operand.hbm [shape: f32[32,32], index: 3, kind: input, shape index: {}]   ;;  %s1925_s4 = inlined_call_operand.vmem [shape: f32[1,32], index: 4, kind: input, shape index: {}]   ;;  %s1926_s5 = inlined_call_operand.vmem [shape: f32[1,32], index: 5, kind: input, shape index: {}]   ;;  %s1927_s6 = inlined_call_operand.hbm [shape: f32[2,32], index: 6, kind: output, shape index: {}]  }
   0x1   :  { %12 = vsyncpa [#allocation6], 0 }
   0x2   :  { %13 = vsyncpa [#allocation9], 0 }
   0x3   :  { %14 = vsyncpa [#allocation4], 0  ;;  %s1637_s21 = smov [#allocation5]   ;;  %s1638_s23 = smov [#allocation2]  }
   0x4   :  { %s33_s22 = sshll.u32 %s1637_s21, 4  ;;  %s20_s24 = sshll.u32 %s1638_s23, 4  ;;  %s34_s22 = int_to_ptr.vmem [resolvable:$true] %s33_s22  ;;  %s21_s24 = int_to_ptr.vmem [resolvable:$true] %s20_s24 }
   0x5   :  { %s1537_s25 = scalar_lea.vmem %s34_s22, 32  ;;  %p1542_p1 = scmp.lt.s32.totalorder %s34_s22, %s34_s22 }
   0x6   :  { %p1538_p0 = scmp.ne.s32.totalorder %s34_s22, %s1537_s25  ;;  %p1543_p2 = scmp.lt.s32.totalorder %s1537_s25, %s1537_s25 }
   0x8   :  { %p1544_p3 = por %p1543_p2, %p1542_p1 }
   0xa   :  { %p1545_p4 = pnand %p1544_p3, %p1538_p0 }
   0xc   :  { %1548 = shalt.err (!%p1545_p4)
}
   0xd   :  { %36 = dma.hbm_to_vmem [thread:$0]  %s1922_s1, 32, %s34_s22, [#allocation6]  }
   0xe   :  { %s1557_s28 = scalar_lea.vmem %s21_s24, 256  ;;  %p1562_p6 = scmp.lt.s32.totalorder %s21_s24, %s21_s24 }
   0xf   :  { %p1558_p5 = scmp.ne.s32.totalorder %s21_s24, %s1557_s28  ;;  %p1563_p7 = scmp.lt.s32.totalorder %s1557_s28, %s1557_s28 }
  0x11   :  { %p1564_p8 = por %p1563_p7, %p1562_p6 }
  0x13   :  { %p1565_p9 = pnand %p1564_p8, %p1558_p5 }
  0x15   :  { %1568 = shalt.err (!%p1565_p9)
}
  0x16   :  { %s1639_s29 = smov 128   ;;  %s1640_s30 = smov 8  }
  0x17   :  { %26 = dma.hbm_to_vmem [thread:$0]  %s1921_s0, 256, %s21_s24, [#allocation3], %s1639_s29, %s1639_s29, %s1640_s30  }
  0x18   :  { %s1641_s9 = smov [#allocation7]   ;;  %s1642_s11 = smov [#allocation8]  }
  0x19   :  { %s42_s10 = sshll.u32 %s1641_s9, 4  ;;  %s54_s12 = sshll.u32 %s1642_s11, 4  ;;  %s43_s10 = int_to_ptr.vmem [resolvable:$true] %s42_s10  ;;  %s55_s12 = int_to_ptr.vmem [resolvable:$true] %s54_s12 }
  0x1a   :  { %s1577_s1 = scalar_lea.vmem %s43_s10, 512  ;;  %p1582_p11 = scmp.lt.s32.totalorder %s43_s10, %s43_s10 }
  0x1b   :  { %p1578_p10 = scmp.ne.s32.totalorder %s43_s10, %s1577_s1  ;;  %p1583_p12 = scmp.lt.s32.totalorder %s1577_s1, %s1577_s1 }
  0x1d   :  { %p1584_p13 = por %p1583_p12, %p1582_p11 }
  0x1f   :  { %p1585_p0 = pnand %p1584_p13, %p1578_p10 }
  0x21   :  { %1588 = shalt.err (!%p1585_p0)
}
  0x22   :  { %48 = dma.hbm_to_vmem [thread:$0]  %s1923_s2, 512, %s43_s10, [#allocation6], %s1639_s29, %s1639_s29, %s1640_s30  }
  0x23   :  { %s1597_s15 = scalar_lea.vmem %s55_s12, 512  ;;  %p1602_p2 = scmp.lt.s32.totalorder %s55_s12, %s55_s12 }
  0x24   :  { %p1598_p1 = scmp.ne.s32.totalorder %s55_s12, %s1597_s15  ;;  %p1603_p3 = scmp.lt.s32.totalorder %s1597_s15, %s1597_s15 }
  0x26   :  { %p1604_p4 = por %p1603_p3, %p1602_p2 }
  0x28   :  { %p1605_p5 = pnand %p1604_p4, %p1598_p1 }
  0x2a   :  { %1608 = shalt.err (!%p1605_p5)
}
  0x2b   :  { %60 = dma.hbm_to_vmem [thread:$0]  %s1924_s3, 512, %s55_s12, [#allocation9], %s1639_s29, %s1639_s29, %s1640_s30  }
  0x2c   :  { %1629 = dma.done.wait [#allocation3], 256  }
  0x2d   :  { %1630 = vsyncadd [#allocation3], 4294967040 }
  0x2e   :  { %1631 = dma.done.wait [#allocation6], 544  }
  0x2f   :  { %1632 = vsyncadd [#allocation6], 4294966752 }
  0x30   :  { %1633 = dma.done.wait [#allocation9], 512  }
  0x31   :  { %1634 = vsyncadd [#allocation9], 4294966784  ;;  %v1643_v0 = vmov 0.0   ;;  %vm1644_vm0 = vmmov 0   ;;  %vm94_vm1 = vcmask 261120   ;;  %v86_v1 = vld [vmem:[#allocation8 + $0x18] sm:$0xff] }
  0x32   :  { %1374 = vmatprep.subr.mxu0 %v1643_v0  ;;  %1385 = vmatprep.subr.mxu1 %v1643_v0  ;;  %v85_v2 = vld [vmem:[#allocation8 + $0x10] sm:$0xff]  ;;  %v84_v3 = vld [vmem:[#allocation8 + $0x8] sm:$0xff]  ;;  %v1701_v4 = vand.u32 4294901760, %v86_v1  ;;  %v83_v7 = vld [vmem:[#allocation8] sm:$0xff]  ;;  %vm1190_vm2 = vcmask 1041409   ;;  %vm1193_vm3 = vcmask 58368  }
  0x33   :  { %1382 = vmatprep.mubr.msk.f32.mxu0 %vm1644_vm0, %v1643_v0  ;;  %1393 = vmatprep.mubr.msk.f32.mxu1 %vm1644_vm0, %v1643_v0  ;;  %v1703_v5 = vand.u32 4294901760, %v85_v2  ;;  %v1705_v6 = vand.u32 4294901760, %v84_v3  ;;  %v1707_v8 = vld [vmem:[#allocation5] sm:$0x3]  ;;  %v1709_v9 = vand.u32 4294901760, %v83_v7  ;;  %v1753_v32 = vld [vmem:[#allocation2] sm:$0xff] }
  0x34   :  { %v96_v10 = vsel %vm94_vm1, %v1707_v8, 0  ;;  %1375 = vmatpush3.msra.mxu0 %v1701_v4  ;;  %v203_v11 = vsub.f32 %v86_v1, %v1701_v4  ;;  %v81_v33 = vld [vmem:[#allocation7 + $0x18] sm:$0xff]  ;;  %v80_v35 = vld [vmem:[#allocation7 + $0x10] sm:$0xff]  ;;  %v586_v36 = vsel %vm94_vm1, %v1753_v32, 0  ;;  %v79_v40 = vld [vmem:[#allocation7 + $0x8] sm:$0xff]  ;;  %vm1287_vm4 = vcmask 254976  }
  0x35   :  { %v1715_v12 = vand.u32 4294901760, %v96_v10  ;;  %v1718_v13 = vsub.f32 %v85_v2, %v1703_v5  ;;  %v1721_v14 = vsub.f32 %v84_v3, %v1705_v6  ;;  %1376 = vmatprep.subr.mxu0 %v1643_v0  ;;  %v1725_v15 = vsub.f32 %v83_v7, %v1709_v9  ;;  %v1757_v34 = vld [vmem:[#allocation2 + $0x8] sm:$0xff]  ;;  %v78_v43 = vld [vmem:[#allocation7] sm:$0xff] }
  0x36   :  { %1377 = vmatpush3.msra.mxu0 %v1703_v5  ;;  %v204_v16 = vand.u32 4294901760, %v203_v11  ;;  %v1766_v37 = vand.u32 4294901760, %v81_v33  ;;  %v589_v38 = vsel %vm94_vm1, %v1757_v34, 0  ;;  %v1775_v39 = vand.u32 4294901760, %v80_v35 }
  0x37   :  { %v1729_v17 = vsub.f32 %v96_v10, %v1715_v12  ;;  %v211_v18 = vand.u32 4294901760, %v1718_v13  ;;  %v218_v19 = vand.u32 4294901760, %v1721_v14  ;;  %1378 = vmatprep.subr.mxu0 %v1643_v0  ;;  %v225_v20 = vand.u32 4294901760, %v1725_v15 }
  0x38   :  { %1379 = vmatpush3.msra.mxu0 %v1705_v6  ;;  %v205_v21 = vsub.f32 %v203_v11, %v204_v16  ;;  %v1777_v41 = vand.u32 4294901760, %v586_v36  ;;  %v1781_v42 = vand.u32 4294901760, %v589_v38  ;;  %v1785_v44 = vsub.f32 %v81_v33, %v1766_v37 }
  0x39   :  { %v169_v22 = vand.u32 4294901760, %v1729_v17  ;;  %v212_v23 = vsub.f32 %v1718_v13, %v211_v18  ;;  %v219_v24 = vsub.f32 %v1721_v14, %v218_v19  ;;  %1380 = vmatprep.subr.mxu0 %v1643_v0  ;;  %v226_v28 = vsub.f32 %v1725_v15, %v225_v20 }
  0x3a   :  { %1381 = vmatpush3.msra.mxu0 %v1709_v9  ;;  %v206_v25 = vand.u32 4294901760, %v205_v21  ;;  %v1789_v45 = vand.u32 4294901760, %v79_v40  ;;  %v1793_v46 = vsub.f32 %v586_v36, %v1777_v41  ;;  %v713_v47 = vsub.f32 %v80_v35, %v1775_v39 }
  0x3b   :  { %v170_v26 = vsub.f32 %v1729_v17, %v169_v22  ;;  %v213_v27 = vand.u32 4294901760, %v212_v23  ;;  %1396 = vmatprep.subr.mxu0 %v1643_v0  ;;  %v220_v30 = vand.u32 4294901760, %v219_v24  ;;  %v227_v31 = vand.u32 4294901760, %v226_v28 }
  0x3c   :  { %1386 = vmatpush3.msra.mxu1 %v206_v25  ;;  %v1798_v48 = vand.u32 4294901760, %v78_v43  ;;  %v1801_v49 = vsub.f32 %v589_v38, %v1781_v42  ;;  %v1807_v50 = vand.u32 4294901760, %v1785_v44  ;;  %v720_v51 = vsub.f32 %v79_v40, %v1789_v45 }
  0x3d   :  { %v171_v29 = vand.u32 4294901760, %v170_v26  ;;  %1387 = vmatprep.subr.mxu1 %v1643_v0  ;;  %v662_v52 = vand.u32 4294901760, %v1793_v46  ;;  %v1817_v53 = vand.u32 4294901760, %v713_v47  ;;  %v1645_v23 = vmov 1966171168  }
  0x3e   :  { %1388 = vmatpush3.msra.mxu1 %v213_v27  ;;  %v672_v54 = vand.u32 4294901760, %v1801_v49  ;;  %v727_v55 = vsub.f32 %v78_v43, %v1798_v48  ;;  %v708_v56 = vsub.f32 %v1785_v44, %v1807_v50  ;;  %v721_v57 = vand.u32 4294901760, %v720_v51 }
  0x3f   :  { %1383 = vmatmul.mubr.f32.vlgmr.msra.gmra.mxu0 %v171_v29  ;;  %1389 = vmatprep.subr.mxu1 %v1643_v0  ;;  %v663_v58 = vsub.f32 %v1793_v46, %v662_v52  ;;  %v715_v59 = vsub.f32 %v713_v47, %v1817_v53  ;;  %v1121_v24 = vunpack.c.l.s4 %v1645_v23  ;;  %v1123_v25 = vlaneseq }
  0x40   :  { %1397 = vmatpush3.msra.mxu0 %v203_v11  ;;  %1390 = vmatpush3.msra.mxu1 %v220_v30  ;;  %v673_v60 = vsub.f32 %v1801_v49, %v672_v54  ;;  %v728_v61 = vand.u32 4294901760, %v727_v55  ;;  %v709_v62 = vand.u32 4294901760, %v708_v56  ;;  %v722_v63 = vsub.f32 %v720_v51, %v721_v57 }
  0x41   :  { %1398 = vmatprep.subr.mxu0 %v1643_v0  ;;  %1391 = vmatprep.subr.mxu1 %v1643_v0  ;;  %v664_v1 = vand.u32 4294901760, %v663_v58  ;;  %v716_v2 = vand.u32 4294901760, %v715_v59  ;;  %v1122_v28 = vunpack.c.0.s8 %v1121_v24  ;;  %v1890_v29 = vshrl.u32 %v1123_v25, 7 }
  0x42   :  { %1399 = vmatpush3.msra.mxu0 %v1718_v13  ;;  %1392 = vmatpush3.msra.mxu1 %v227_v31  ;;  %v674_v3 = vand.u32 4294901760, %v673_v60 }
  0x43   :  { %1400 = vmatprep.subr.mxu0 %v1643_v0  ;;  %1394 = vmatmul.mubr.f32.vlgmr.msra.gmra.mxu1 %v1715_v12  ;;  %v1125_v36 = vsub.s32 %v1122_v28, %v1890_v29 }
  0x44   :  { %1401 = vmatpush3.msra.mxu0 %v1721_v14  ;;  %1407 = vmatprep.subr.mxu1 %v1643_v0 }
  0x45   :  { %1402 = vmatprep.subr.mxu0 %v1643_v0  ;;  %1408 = vmatpush3.msra.mxu1 %v1701_v4 }
  0x46   :  { %1403 = vmatpush3.msra.mxu0 %v1725_v15  ;;  %1404 = vmatprep.mubr.msk.f32.mxu0 %vm1644_vm0, %v1643_v0 }
  0x47   :  { %1409 = vmatprep.subr.mxu1 %v1643_v0  ;;  %1418 = vmatprep.subr.mxu0 %v1643_v0 }
  0x48   :  { %1405 = vmatmul.mubr.f32.vlgmr.msra.gmra.mxu0 %v1729_v17  ;;  %1410 = vmatpush3.msra.mxu1 %v1703_v5  ;;  %v1306_v17 = vld [vmem:[%s1925_s4] ss:$0 sm:$0xff] }
  0x49   :  { %1419 = vmatpush3.msra.mxu0 %v204_v16  ;;  %1411 = vmatprep.subr.mxu1 %v1643_v0 }
  0x4a   :  { %1420 = vmatprep.subr.mxu0 %v1643_v0  ;;  %1412 = vmatpush3.msra.mxu1 %v1705_v6 }
  0x4b   :  { %1421 = vmatpush3.msra.mxu0 %v211_v18  ;;  %1413 = vmatprep.subr.mxu1 %v1643_v0 }
  0x4c   :  { %1422 = vmatprep.subr.mxu0 %v1643_v0  ;;  %1414 = vmatpush3.msra.mxu1 %v1709_v9 }
  0x4d   :  { %1415 = vmatprep.mubr.msk.f32.mxu1 %vm1644_vm0, %v1643_v0  ;;  %1423 = vmatpush3.msra.mxu0 %v218_v19 }
  0x4e   :  { %1416 = vmatmul.mubr.f32.vlgmr.msra.gmra.mxu1 %v169_v22  ;;  %1424 = vmatprep.subr.mxu0 %v1643_v0 }
  0x4f   :  { %1429 = vmatprep.subr.mxu1 %v1643_v0  ;;  %1425 = vmatpush3.msra.mxu0 %v225_v20 }
  0x50   :  { %1426 = vmatprep.mubr.msk.f32.mxu0 %vm1644_vm0, %v1643_v0  ;;  %1430 = vmatpush3.msra.mxu1 %v1701_v4  ;;  %v729_v4 = vsub.f32 %v727_v55, %v728_v61 }
  0x51   :  { %1427 = vmatmul.mubr.f32.vlgmr.msra.gmra.mxu0 %v1715_v12  ;;  %1431 = vmatprep.subr.mxu1 %v1643_v0 }
  0x52   :  { %1440 = vmatprep.subr.mxu0 %v1766_v37  ;;  %1432 = vmatpush3.msra.mxu1 %v1703_v5  ;;  %v723_v5 = vand.u32 4294901760, %v722_v63 }
  0x53   :  { %1441 = vmatpush3.msra.mxu0 %v1766_v37  ;;  %1433 = vmatprep.subr.mxu1 %v1643_v0 }
  0x54   :  { %1442 = vmatprep.subr.mxu0 %v1775_v39  ;;  %1434 = vmatpush3.msra.mxu1 %v1705_v6 }
  0x55   :  { %1443 = vmatpush3.msra.mxu0 %v1775_v39  ;;  %1435 = vmatprep.subr.mxu1 %v1643_v0 }
  0x56   :  { %1444 = vmatprep.subr.mxu0 %v1789_v45  ;;  %1436 = vmatpush3.msra.mxu1 %v1709_v9 }
  0x57   :  { %1437 = vmatprep.mubr.msk.f32.mxu1 %vm1644_vm0, %v1643_v0  ;;  %1445 = vmatpush3.msra.mxu0 %v1789_v45  ;;  %v730_v0 = vand.u32 4294901760, %v729_v4 }
  0x58   :  { %1438 = vmatmul.mubr.f32.vlgmr.msra.gmra.mxu1 %v1715_v12  ;;  %1446 = vmatprep.subr.mxu0 %v1798_v48 }
  0x59   :  { %1451 = vmatprep.subr.mxu1 %v709_v62  ;;  %1447 = vmatpush3.msra.mxu0 %v1798_v48 }
  0x5a   :  { %1452 = vmatpush3.msra.mxu1 %v709_v62  ;;  %1448 = vmatprep.mubr.f32.mxu0 %v664_v1 }
  0x5b   :  { %1453 = vmatprep.subr.mxu1 %v716_v2  ;;  %1462 = vmatprep.subr.mxu0 %v1785_v44 }
  0x5c   :  { %1449 = vmatmul.mubr.f32.vlgmr.msra.gmra.mxu0 %v674_v3  ;;  %1454 = vmatpush3.msra.mxu1 %v716_v2 }
  0x5d   :  { %1463 = vmatpush3.msra.mxu0 %v1785_v44  ;;  %1455 = vmatprep.subr.mxu1 %v723_v5 }
  0x5e   :  { %1464 = vmatprep.subr.mxu0 %v713_v47  ;;  %1456 = vmatpush3.msra.mxu1 %v723_v5 }
  0x5f   :  { %1465 = vmatpush3.msra.mxu0 %v713_v47  ;;  %1457 = vmatprep.subr.mxu1 %v730_v0 }
  0x60   :  { %1466 = vmatprep.subr.mxu0 %v720_v51  ;;  %1458 = vmatpush3.msra.mxu1 %v730_v0 }
  0x61   :  { %1459 = vmatprep.mubr.f32.mxu1 %v1777_v41  ;;  %1467 = vmatpush3.msra.mxu0 %v720_v51 }
  0x62   :  { %1460 = vmatmul.mubr.f32.vlgmr.msra.gmra.mxu1 %v1781_v42  ;;  %1468 = vmatprep.subr.mxu0 %v727_v55 }
  0x63   :  { %1473 = vmatprep.subr.mxu1 %v1766_v37  ;;  %1469 = vmatpush3.msra.mxu0 %v727_v55  ;;  %v1894_v55 = vsub.s32 0, %v1890_v29 }
  0x64   :  { %1470 = vmatprep.mubr.f32.mxu0 %v1793_v46  ;;  %1474 = vmatpush3.msra.mxu1 %v1766_v37 }
  0x65   :  { %1471 = vmatmul.mubr.f32.vlgmr.msra.gmra.mxu0 %v1801_v49  ;;  %1475 = vmatprep.subr.mxu1 %v1775_v39 }
  0x66   :  { %1484 = vmatprep.subr.mxu0 %v1807_v50  ;;  %1476 = vmatpush3.msra.mxu1 %v1775_v39 }
  0x67   :  { %1485 = vmatpush3.msra.mxu0 %v1807_v50  ;;  %1477 = vmatprep.subr.mxu1 %v1789_v45 }
  0x68   :  { %1486 = vmatprep.subr.mxu0 %v1817_v53  ;;  %1478 = vmatpush3.msra.mxu1 %v1789_v45 }
  0x69   :  { %1487 = vmatpush3.msra.mxu0 %v1817_v53  ;;  %1479 = vmatprep.subr.mxu1 %v1798_v48 }
  0x6a   :  { %1488 = vmatprep.subr.mxu0 %v721_v57  ;;  %1480 = vmatpush3.msra.mxu1 %v1798_v48 }
  0x6b   :  { %1481 = vmatprep.mubr.f32.mxu1 %v662_v52  ;;  %1489 = vmatpush3.msra.mxu0 %v721_v57 }
  0x6c   :  { %1482 = vmatmul.mubr.f32.vlgmr.msra.gmra.mxu1 %v672_v54  ;;  %1490 = vmatprep.subr.mxu0 %v728_v61 }
  0x6d   :  { %1495 = vmatprep.subr.mxu1 %v1766_v37  ;;  %1491 = vmatpush3.msra.mxu0 %v728_v61 }
  0x6e   :  { %1492 = vmatprep.mubr.f32.mxu0 %v1777_v41  ;;  %1496 = vmatpush3.msra.mxu1 %v1766_v37 }
  0x6f   :  { %1493 = vmatmul.mubr.f32.vlgmr.msra.gmra.mxu0 %v1781_v42  ;;  %1497 = vmatprep.subr.mxu1 %v1775_v39 }
  0x70   :  { %1503 = vmatprep.mubr.f32.mxu1 %v1777_v41  ;;  %1498 = vmatpush3.msra.mxu1 %v1775_v39 }
  0x71   :  { %1499 = vmatprep.subr.mxu1 %v1789_v45 }
  0x72   :  { %1500 = vmatpush3.msra.mxu1 %v1789_v45 }
  0x73   :  { %1501 = vmatprep.subr.mxu1 %v1798_v48 }
  0x74   :  { %1502 = vmatpush3.msra.mxu1 %v1798_v48 }
  0x75   :  { %1504 = vmatmul.mubr.f32.vlgmr.msra.gmra.mxu1 %v1781_v42 }
  0xff   :  { %v173_v6 = vpop.f32.mrf.mxu0 }
 0x100   :  { %v174_v18 = vadd.f32 %v1306_v17, %v173_v6  ;;  %v1181_v17 = vand.u32 127, %v1123_v25 }
 0x101   :  { %v1384_v7 = vpop.f32.mrf.mxu0 }
 0x103   :  { %v264_v9 = vpop.f32.mrf.mxu1 }
 0x104   :  { %v265_v21 = vadd.f32 %v264_v9, %v174_v18 }
 0x105   :  { %v1395_v10 = vpop.f32.mrf.mxu1 }
 0x108   :  { %v344_v11 = vpop.f32.mrf.mxu0 }
 0x109   :  { %v345_v22 = vadd.f32 %v344_v11, %v265_v21 }
 0x10a   :  { %v1406_v12 = vpop.f32.mrf.mxu0 }
 0x10b   :  { %v1307_v12 = vld [vmem:[%s1926_s5] ss:$0 sm:$0xff]  ;;  %s1647_s5 = smov [#allocation10]  }
 0x10c   :  { %s1295_s18 = sshll.u32 %s1647_s5, 4  ;;  %s1296_s18 = int_to_ptr.vmem [resolvable:$true] %s1295_s18 }
 0x10d   :  { %s1609_s19 = scalar_lea.vmem %s1296_s18, 32  ;;  %p1614_p7 = scmp.lt.s32.totalorder %s1296_s18, %s1296_s18 }
 0x10e   :  { %v421_v13 = vpop.f32.mrf.mxu1  ;;  %p1610_p6 = scmp.ne.s32.totalorder %s1296_s18, %s1609_s19  ;;  %p1615_p8 = scmp.lt.s32.totalorder %s1609_s19, %s1609_s19 }
 0x10f   :  { %v422_v26 = vadd.f32 %v421_v13, %v345_v22 }
 0x110   :  { %v1417_v14 = vpop.f32.mrf.mxu1  ;;  %p1616_p9 = por %p1615_p8, %p1614_p7 }
 0x111   :  { %v504_v15 = vpop.f32.mrf.mxu0 }
 0x112   :  { %v505_v30 = vadd.f32 %v504_v15, %v422_v26  ;;  %v1646_v26 = vmov 0   ;;  %p1617_p10 = pnand %p1616_p9, %p1610_p6 }
 0x113   :  { %v1428_v16 = vpop.f32.mrf.mxu0  ;;  %1518 = vset.pattern.permute.xlu0 %v1646_v26  ;;  %1517 = vset.pattern.permute.xlu1 %v1646_v26 }
 0x118   :  { %v579_v19 = vpop.f32.mrf.mxu1 }
 0x119   :  { %v580_v35 = vadd.f32 %v579_v19, %v505_v30  ;;  %v1184_v19 = vsub.s32 %v1181_v17, %v1890_v29 }
 0x11a   :  { %v1439_v20 = vpop.f32.mrf.mxu1 }
 0x11b   :  { %v1126_v39 = vrot.slane %v580_v35, %v1125_v36 }
 0x11c   :  { %v1450_v27 = vpop.f32.mrf.mxu0 }
 0x11d   :  { %v1127_v44 = vcombine.high %v1126_v39, %v1126_v39  ;;  %v1134_v53 = vrot.slane %v1126_v39, %v1125_v36 }
 0x11e   :  { %v666_v31 = vpop.f32.mrf.mxu0 }
 0x11f   :  { %v1141_v51 = vrot.slane %v1127_v44, %v1125_v36  ;;  %v1145_v63 = vrot.slane %v1134_v53, %v1894_v55 }
 0x121   :  { %v1149_v59 = vrot.slane %v1141_v51, %v1894_v55 }
 0x122   :  { %v1461_v33 = vpop.f32.mrf.mxu1 }
 0x123   :  { %v774_v40 = vadd.f32 %v1461_v33, %v1450_v27  ;;  %v1204_v27 = vsub.s32 1, %v1890_v29 }
 0x124   :  { %v767_v37 = vpop.f32.mrf.mxu1 }
 0x125   :  { %v1472_v38 = vpop.f32.mrf.mxu0  ;;  %v768_v42 = vadd.f32 %v767_v37, %v666_v31 }
 0x126   :  { %v861_v45 = vadd.f32 %v1472_v38, %v774_v40 }
 0x127   :  { %v853_v43 = vpop.f32.mrf.mxu0 }
 0x128   :  { %v854_v48 = vadd.f32 %v853_v43, %v768_v42 }
 0x12c   :  { %v1483_v41 = vpop.f32.mrf.mxu1 }
 0x12d   :  { %v946_v49 = vadd.f32 %v1483_v41, %v861_v45 }
 0x12e   :  { %v937_v46 = vpop.f32.mrf.mxu1 }
 0x12f   :  { %v1494_v47 = vpop.f32.mrf.mxu0  ;;  %v938_v50 = vadd.f32 %v937_v46, %v854_v48 }
 0x130   :  { %v1035_v54 = vadd.f32 %v1494_v47, %v946_v49 }
 0x131   :  { %v1028_v52 = vpop.f32.mrf.mxu0 }
 0x132   :  { %v1029_v57 = vadd.f32 %v1028_v52, %v938_v50 }
 0x135   :  { %v1505_v56 = vpop.f32.mrf.mxu1 }
 0x136   :  { %v1116_v58 = vadd.f32 %v1505_v56, %v1035_v54 }
 0x137   :  { %v1109_v60 = vpop.f32.mrf.mxu1 }
 0x138   :  { %v1153_v61 = vadd.f32 %v1149_v59, %v1116_v58  ;;  %v1110_v62 = vadd.f32 %v1109_v60, %v1029_v57 }
 0x13a   :  { %v1157_v1 = vmul.f32 0.70710677, %v1153_v61  ;;  %v1152_v2 = vadd.f32 %v1145_v63, %v1110_v62  ;;  %v1155_v6 = vmul.f32 0.5, %v1153_v61 }
 0x13c   :  { %1519 = verf.f32 %v1157_v1  ;;  %v1156_v3 = vmul.f32 0.70710677, %v1152_v2  ;;  %v1154_v7 = vmul.f32 0.5, %v1152_v2  ;;  %v1277_v1 = vrot.slane %v1707_v8, 1 }
 0x13e   :  { %1521 = verf.f32 %v1156_v3 }
 0x149   :  { %v1520_v4 = vpop.eup %1519 }
 0x14a   :  { %v1161_v5 = vadd.f32 1.0, %v1520_v4 }
 0x14b   :  { %v1522_v0 = vpop.eup %1521 }
 0x14c   :  { %v1160_v9 = vadd.f32 1.0, %v1522_v0  ;;  %v1163_v11 = vmul.f32 %v1161_v5, %v1155_v6 }
 0x14e   :  { %v1162_v10 = vmul.f32 %v1160_v9, %v1154_v7  ;;  %v1171_v15 = vmul.f32 %v1307_v12, %v1163_v11 }
 0x150   :  { %v1170_v13 = vmul.f32 %v1307_v12, %v1162_v10  ;;  %v1175_v16 = vsel %vm94_vm1, %v1171_v15, 0.0 }
 0x152   :  { %v1172_v14 = vsel %vm94_vm1, %v1170_v13, 0.0 }
 0x153   :  { %1173 = vadd.xlane.f32.xlu0 %v1172_v14 }
 0x157   :  { %1176 = vadd.xlane.f32.xlu0 %v1175_v16 }
 0x1dc   :  { %v1174_v18 = vpop.xlane.xlu0 %1173 }
 0x1dd   :  { %v1185_v21 = vrot.slane %v1174_v18, %v1184_v19 }
 0x1e0   :  { %v1177_v20 = vpop.xlane.xlu0 %1176 }
 0x1e1   :  { %v1189_v22 = vrot.slane %v1177_v20, %v1184_v19 }
 0x1e3   :  { %v1191_v23 = vsel %vm1190_vm2, %v1189_v22, %v1185_v21 }
 0x1e4   :  { %v1194_v24 = vsel %vm1193_vm3, %v1191_v23, -inf }
 0x1e5   :  { %1195 = vmax.xlane.f32.xlu1 %v1194_v24 }
 0x26e   :  { %v1196_v28 = vpop.xlane.xlu1 %1195 }
 0x26f   :  { %v1201_v25 = vrot.slane %v1196_v28, %v1894_v55  ;;  %v1205_v30 = vrot.slane %v1196_v28, %v1204_v27 }
 0x271   :  { %v1208_v31 = vsub.f32 %v1174_v18, %v1201_v25  ;;  %v1209_v33 = vsub.f32 %v1177_v20, %v1205_v30 }
 0x273   :  { %v1210_v35 = vmul.f32 1.442695, %v1208_v31  ;;  %v1212_v36 = vmul.f32 1.442695, %v1209_v33 }
 0x275   :  { %1523 = vpow2.f32 %v1210_v35 }
 0x276   :  { %1525 = vpow2.f32 %v1212_v36 }
 0x282   :  { %v1524_v37 = vpop.eup %1523 }
 0x283   :  { %v1526_v38 = vpop.eup %1525  ;;  %1217 = vperm.xlu1 %1517, %v1524_v37  }
 0x284   :  { %1220 = vperm.xlu0 %1518, %v1526_v38  }
 0x2fe   :  { %v1218_v39 = vpop.permute.xlu1 %1217 }
 0x2ff   :  { %v1221_v40 = vpop.permute.xlu0 %1220  ;;  %v1225_v41 = vrot.slane %v1218_v39, %v1184_v19 }
 0x300   :  { %v1229_v42 = vrot.slane %v1221_v40, %v1184_v19 }
 0x302   :  { %v1230_v29 = vsel %vm1190_vm2, %v1229_v42, %v1225_v41 }
 0x303   :  { %v1232_v43 = vsel %vm1193_vm3, %v1230_v29, 0.0 }
 0x304   :  { %1233 = vadd.xlane.f32.xlu1 %v1232_v43 }
 0x38d   :  { %v1234_v44 = vpop.xlane.xlu1 %1233 }
 0x38e   :  { %1527 = vrcp.f32 %v1234_v44 }
 0x39b   :  { %v1528_v45 = vpop.eup %1527 }
 0x39c   :  { %v1244_v46 = vrot.slane %v1528_v45, %v1204_v27  ;;  %v1240_v48 = vrot.slane %v1528_v45, %v1894_v55 }
 0x39e   :  { %v1248_v47 = vmul.f32 %v1526_v38, %v1244_v46  ;;  %v1247_v49 = vmul.f32 %v1524_v37, %v1240_v48 }
 0x3a0   :  { %1256 = vperm.xlu0 %1518, %v1248_v47  }
 0x3a4   :  { %1251 = vperm.xlu0 %1518, %v1247_v49  }
 0x41b   :  { %v1257_v50 = vpop.permute.xlu0 %1256 }
 0x41c   :  { %v1260_v51 = vmul.f32 %v1257_v50, %v1757_v34 }
 0x41e   :  { %v1268_v52 = vsel %vm94_vm1, %v1260_v51, 0.0 }
 0x41f   :  { %v1269_v53 = vrot.slane %v1268_v52, 4  ;;  %v1252_v54 = vpop.permute.xlu0 %1251 }
 0x420   :  { %v1259_v56 = vmul.f32 %v1252_v54, %v1753_v32 }
 0x421   :  { %v1270_v57 = vadd.f32 %v1269_v53, %v1268_v52 }
 0x422   :  { %v1261_v58 = vsel %vm94_vm1, %v1259_v56, 0.0 }
 0x423   :  { %v1271_v59 = vrot.slane %v1270_v57, 2  ;;  %v1262_v60 = vrot.slane %v1261_v58, 4 }
 0x425   :  { %v1272_v61 = vadd.f32 %v1271_v59, %v1270_v57  ;;  %v1263_v62 = vadd.f32 %v1262_v60, %v1261_v58 }
 0x427   :  { %v1273_v55 = vrot.slane %v1272_v61, 1  ;;  %v1264_v63 = vrot.slane %v1263_v62, 2 }
 0x429   :  { %v1274_v2 = vadd.f32 %v1273_v55, %v1272_v61  ;;  %v1265_v3 = vadd.f32 %v1264_v63, %v1263_v62 }
 0x42b   :  { %v1266_v34 = vrot.slane %v1265_v3, 1  ;;  %v1281_v4 = vadd.f32 %v1277_v1, %v1274_v2 }
 0x42d   :  { %v1267_v5 = vadd.f32 %v1266_v34, %v1265_v3  ;;  %v1284_v0 = vrot.slane %v1281_v4, 7 }
 0x42f   :  { %v1280_v32 = vadd.f32 %v1267_v5, %v1707_v8 }
 0x431   :  { %v1285_v6 = vsel %vm1190_vm2, %v1284_v0, %v1280_v32 }
 0x432   :  { %1288 = vst.msk [vmem:[#allocation10] sm:$0x3] %vm1287_vm4, %v1285_v6 }
 0x433   :  { %1620 = shalt.err (!%p1617_p10)
}
 0x434   :  { %1298 = dma.vmem_to_hbm [thread:$0]  %s1296_s18, 32, %s1927_s6, [#allocation4]  }
 0x435   :  { %1635 = dma.done.wait [#allocation4], 32  }
 0x436   :  { %1636 = vsyncadd [#allocation4], 4294967264 }
 0x437   :  { %1302 = vsyncpa [#allocation3], 1 }
 0x438   :  { %1303 = vsyncpa [#allocation6], 1 }
 0x439   :  { %1304 = vsyncpa [#allocation9], 1 }
 0x43a   :  { %1305 = vsyncpa [#allocation4], 1 }

// kernel: tpu_custom_call.1
= control target key start
LH: loop header
LB: loop body
LE: loop exit
PB: predicated region body
PF: predicated region fallthrough
CT: control target
= control target key end

     0   :  { %11 = vsyncpa [#allocation3], 0  ;;  %s1921_s0 = inlined_call_operand.hbm [shape: f32[2,8,32], index: 0, kind: input, shape index: {}]   ;;  %s1922_s1 = inlined_call_operand.hbm [shape: f32[2,32], index: 1, kind: input, shape index: {}]   ;;  %s1923_s2 = inlined_call_operand.hbm [shape: f32[32,32], index: 2, kind: input, shape index: {}]   ;;  %s1924_s3 = inlined_call_operand.hbm [shape: f32[32,32], index: 3, kind: input, shape index: {}]   ;;  %s1925_s4 = inlined_call_operand.vmem [shape: f32[1,32], index: 4, kind: input, shape index: {}]   ;;  %s1926_s5 = inlined_call_operand.vmem [shape: f32[1,32], index: 5, kind: input, shape index: {}]   ;;  %s1927_s6 = inlined_call_operand.hbm [shape: f32[2,32], index: 6, kind: output, shape index: {}]  }
   0x1   :  { %12 = vsyncpa [#allocation6], 0 }
   0x2   :  { %13 = vsyncpa [#allocation9], 0 }
   0x3   :  { %14 = vsyncpa [#allocation4], 0  ;;  %s1637_s21 = smov [#allocation5]   ;;  %s1638_s23 = smov [#allocation2]  }
   0x4   :  { %s33_s22 = sshll.u32 %s1637_s21, 4  ;;  %s20_s24 = sshll.u32 %s1638_s23, 4  ;;  %s34_s22 = int_to_ptr.vmem [resolvable:$true] %s33_s22  ;;  %s21_s24 = int_to_ptr.vmem [resolvable:$true] %s20_s24 }
   0x5   :  { %s1537_s25 = scalar_lea.vmem %s34_s22, 32  ;;  %p1542_p1 = scmp.lt.s32.totalorder %s34_s22, %s34_s22 }
   0x6   :  { %p1538_p0 = scmp.ne.s32.totalorder %s34_s22, %s1537_s25  ;;  %p1543_p2 = scmp.lt.s32.totalorder %s1537_s25, %s1537_s25 }
   0x8   :  { %p1544_p3 = por %p1543_p2, %p1542_p1 }
   0xa   :  { %p1545_p4 = pnand %p1544_p3, %p1538_p0 }
   0xc   :  { %1548 = shalt.err (!%p1545_p4)
}
   0xd   :  { %36 = dma.hbm_to_vmem [thread:$0]  %s1922_s1, 32, %s34_s22, [#allocation6]  }
   0xe   :  { %s1557_s28 = scalar_lea.vmem %s21_s24, 256  ;;  %p1562_p6 = scmp.lt.s32.totalorder %s21_s24, %s21_s24 }
   0xf   :  { %p1558_p5 = scmp.ne.s32.totalorder %s21_s24, %s1557_s28  ;;  %p1563_p7 = scmp.lt.s32.totalorder %s1557_s28, %s1557_s28 }
  0x11   :  { %p1564_p8 = por %p1563_p7, %p1562_p6 }
  0x13   :  { %p1565_p9 = pnand %p1564_p8, %p1558_p5 }
  0x15   :  { %1568 = shalt.err (!%p1565_p9)
}
  0x16   :  { %s1639_s29 = smov 128   ;;  %s1640_s30 = smov 8  }
  0x17   :  { %26 = dma.hbm_to_vmem [thread:$0]  %s1921_s0, 256, %s21_s24, [#allocation3], %s1639_s29, %s1639_s29, %s1640_s30  }
  0x18   :  { %s1641_s9 = smov [#allocation7]   ;;  %s1642_s11 = smov [#allocation8]  }
  0x19   :  { %s42_s10 = sshll.u32 %s1641_s9, 4  ;;  %s54_s12 = sshll.u32 %s1642_s11, 4  ;;  %s43_s10 = int_to_ptr.vmem [resolvable:$true] %s42_s10  ;;  %s55_s12 = int_to_ptr.vmem [resolvable:$true] %s54_s12 }
  0x1a   :  { %s1577_s1 = scalar_lea.vmem %s43_s10, 512  ;;  %p1582_p11 = scmp.lt.s32.totalorder %s43_s10, %s43_s10 }
  0x1b   :  { %p1578_p10 = scmp.ne.s32.totalorder %s43_s10, %s1577_s1  ;;  %p1583_p12 = scmp.lt.s32.totalorder %s1577_s1, %s1577_s1 }
  0x1d   :  { %p1584_p13 = por %p1583_p12, %p1582_p11 }
  0x1f   :  { %p1585_p0 = pnand %p1584_p13, %p1578_p10 }
  0x21   :  { %1588 = shalt.err (!%p1585_p0)
}
  0x22   :  { %48 = dma.hbm_to_vmem [thread:$0]  %s1923_s2, 512, %s43_s10, [#allocation6], %s1639_s29, %s1639_s29, %s1640_s30  }
  0x23   :  { %s1597_s15 = scalar_lea.vmem %s55_s12, 512  ;;  %p1602_p2 = scmp.lt.s32.totalorder %s55_s12, %s55_s12 }
  0x24   :  { %p1598_p1 = scmp.ne.s32.totalorder %s55_s12, %s1597_s15  ;;  %p1603_p3 = scmp.lt.s32.totalorder %s1597_s15, %s1597_s15 }
  0x26   :  { %p1604_p4 = por %p1603_p3, %p1602_p2 }
  0x28   :  { %p1605_p5 = pnand %p1604_p4, %p1598_p1 }
  0x2a   :  { %1608 = shalt.err (!%p1605_p5)
}
  0x2b   :  { %60 = dma.hbm_to_vmem [thread:$0]  %s1924_s3, 512, %s55_s12, [#allocation9], %s1639_s29, %s1639_s29, %s1640_s30  }
  0x2c   :  { %1629 = dma.done.wait [#allocation3], 256  }
  0x2d   :  { %1630 = vsyncadd [#allocation3], 4294967040 }
  0x2e   :  { %1631 = dma.done.wait [#allocation6], 544  }
  0x2f   :  { %1632 = vsyncadd [#allocation6], 4294966752 }
  0x30   :  { %1633 = dma.done.wait [#allocation9], 512  }
  0x31   :  { %1634 = vsyncadd [#allocation9], 4294966784  ;;  %v1643_v0 = vmov 0.0   ;;  %vm1644_vm0 = vmmov 0   ;;  %vm94_vm1 = vcmask 261120   ;;  %v86_v1 = vld [vmem:[#allocation8 + $0x18] sm:$0xff] }
  0x32   :  { %1374 = vmatprep.subr.mxu0 %v1643_v0  ;;  %1385 = vmatprep.subr.mxu1 %v1643_v0  ;;  %v85_v2 = vld [vmem:[#allocation8 + $0x10] sm:$0xff]  ;;  %v84_v3 = vld [vmem:[#allocation8 + $0x8] sm:$0xff]  ;;  %v1701_v4 = vand.u32 4294901760, %v86_v1  ;;  %v83_v7 = vld [vmem:[#allocation8] sm:$0xff]  ;;  %vm1190_vm2 = vcmask 1041409   ;;  %vm1193_vm3 = vcmask 58368  }
  0x33   :  { %1382 = vmatprep.mubr.msk.f32.mxu0 %vm1644_vm0, %v1643_v0  ;;  %1393 = vmatprep.mubr.msk.f32.mxu1 %vm1644_vm0, %v1643_v0  ;;  %v1703_v5 = vand.u32 4294901760, %v85_v2  ;;  %v1705_v6 = vand.u32 4294901760, %v84_v3  ;;  %v1707_v8 = vld [vmem:[#allocation5] sm:$0x3]  ;;  %v1709_v9 = vand.u32 4294901760, %v83_v7  ;;  %v1753_v32 = vld [vmem:[#allocation2] sm:$0xff] }
  0x34   :  { %v96_v10 = vsel %vm94_vm1, %v1707_v8, 0  ;;  %1375 = vmatpush3.msra.mxu0 %v1701_v4  ;;  %v203_v11 = vsub.f32 %v86_v1, %v1701_v4  ;;  %v81_v33 = vld [vmem:[#allocation7 + $0x18] sm:$0xff]  ;;  %v80_v35 = vld [vmem:[#allocation7 + $0x10] sm:$0xff]  ;;  %v586_v36 = vsel %vm94_vm1, %v1753_v32, 0  ;;  %v79_v40 = vld [vmem:[#allocation7 + $0x8] sm:$0xff]  ;;  %vm1287_vm4 = vcmask 254976  }
  0x35   :  { %v1715_v12 = vand.u32 4294901760, %v96_v10  ;;  %v1718_v13 = vsub.f32 %v85_v2, %v1703_v5  ;;  %v1721_v14 = vsub.f32 %v84_v3, %v1705_v6  ;;  %1376 = vmatprep.subr.mxu0 %v1643_v0  ;;  %v1725_v15 = vsub.f32 %v83_v7, %v1709_v9  ;;  %v1757_v34 = vld [vmem:[#allocation2 + $0x8] sm:$0xff]  ;;  %v78_v43 = vld [vmem:[#allocation7] sm:$0xff] }
  0x36   :  { %1377 = vmatpush3.msra.mxu0 %v1703_v5  ;;  %v204_v16 = vand.u32 4294901760, %v203_v11  ;;  %v1766_v37 = vand.u32 4294901760, %v81_v33  ;;  %v589_v38 = vsel %vm94_vm1, %v1757_v34, 0  ;;  %v1775_v39 = vand.u32 4294901760, %v80_v35 }
  0x37   :  { %v1729_v17 = vsub.f32 %v96_v10, %v1715_v12  ;;  %v211_v18 = vand.u32 4294901760, %v1718_v13  ;;  %v218_v19 = vand.u32 4294901760, %v1721_v14  ;;  %1378 = vmatprep.subr.mxu0 %v1643_v0  ;;  %v225_v20 = vand.u32 4294901760, %v1725_v15 }
  0x38   :  { %1379 = vmatpush3.msra.mxu0 %v1705_v6  ;;  %v205_v21 = vsub.f32 %v203_v11, %v204_v16  ;;  %v1777_v41 = vand.u32 4294901760, %v586_v36  ;;  %v1781_v42 = vand.u32 4294901760, %v589_v38  ;;  %v1785_v44 = vsub.f32 %v81_v33, %v1766_v37 }
  0x39   :  { %v169_v22 = vand.u32 4294901760, %v1729_v17  ;;  %v212_v23 = vsub.f32 %v1718_v13, %v211_v18  ;;  %v219_v24 = vsub.f32 %v1721_v14, %v218_v19  ;;  %1380 = vmatprep.subr.mxu0 %v1643_v0  ;;  %v226_v28 = vsub.f32 %v1725_v15, %v225_v20 }
  0x3a   :  { %1381 = vmatpush3.msra.mxu0 %v1709_v9  ;;  %v206_v25 = vand.u32 4294901760, %v205_v21  ;;  %v1789_v45 = vand.u32 4294901760, %v79_v40  ;;  %v1793_v46 = vsub.f32 %v586_v36, %v1777_v41  ;;  %v713_v47 = vsub.f32 %v80_v35, %v1775_v39 }
  0x3b   :  { %v170_v26 = vsub.f32 %v1729_v17, %v169_v22  ;;  %v213_v27 = vand.u32 4294901760, %v212_v23  ;;  %1396 = vmatprep.subr.mxu0 %v1643_v0  ;;  %v220_v30 = vand.u32 4294901760, %v219_v24  ;;  %v227_v31 = vand.u32 4294901760, %v226_v28 }
  0x3c   :  { %1386 = vmatpush3.msra.mxu1 %v206_v25  ;;  %v1798_v48 = vand.u32 4294901760, %v78_v43  ;;  %v1801_v49 = vsub.f32 %v589_v38, %v1781_v42  ;;  %v1807_v50 = vand.u32 4294901760, %v1785_v44  ;;  %v720_v51 = vsub.f32 %v79_v40, %v1789_v45 }
  0x3d   :  { %v171_v29 = vand.u32 4294901760, %v170_v26  ;;  %1387 = vmatprep.subr.mxu1 %v1643_v0  ;;  %v662_v52 = vand.u32 4294901760, %v1793_v46  ;;  %v1817_v53 = vand.u32 4294901760, %v713_v47  ;;  %v1645_v23 = vmov 1966171168  }
  0x3e   :  { %1388 = vmatpush3.msra.mxu1 %v213_v27  ;;  %v672_v54 = vand.u32 4294901760, %v1801_v49  ;;  %v727_v55 = vsub.f32 %v78_v43, %v1798_v48  ;;  %v708_v56 = vsub.f32 %v1785_v44, %v1807_v50  ;;  %v721_v57 = vand.u32 4294901760, %v720_v51 }
  0x3f   :  { %1383 = vmatmul.mubr.f32.vlgmr.msra.gmra.mxu0 %v171_v29  ;;  %1389 = vmatprep.subr.mxu1 %v1643_v0  ;;  %v663_v58 = vsub.f32 %v1793_v46, %v662_v52  ;;  %v715_v59 = vsub.f32 %v713_v47, %v1817_v53  ;;  %v1121_v24 = vunpack.c.l.s4 %v1645_v23  ;;  %v1123_v25 = vlaneseq }
  0x40   :  { %1397 = vmatpush3.msra.mxu0 %v203_v11  ;;  %1390 = vmatpush3.msra.mxu1 %v220_v30  ;;  %v673_v60 = vsub.f32 %v1801_v49, %v672_v54  ;;  %v728_v61 = vand.u32 4294901760, %v727_v55  ;;  %v709_v62 = vand.u32 4294901760, %v708_v56  ;;  %v722_v63 = vsub.f32 %v720_v51, %v721_v57 }
  0x41   :  { %1398 = vmatprep.subr.mxu0 %v1643_v0  ;;  %1391 = vmatprep.subr.mxu1 %v1643_v0  ;;  %v664_v1 = vand.u32 4294901760, %v663_v58  ;;  %v716_v2 = vand.u32 4294901760, %v715_v59  ;;  %v1122_v28 = vunpack.c.0.s8 %v1121_v24  ;;  %v1890_v29 = vshrl.u32 %v1123_v25, 7 }
  0x42   :  { %1399 = vmatpush3.msra.mxu0 %v1718_v13  ;;  %1392 = vmatpush3.msra.mxu1 %v227_v31  ;;  %v674_v3 = vand.u32 4294901760, %v673_v60 }
  0x43   :  { %1400 = vmatprep.subr.mxu0 %v1643_v0  ;;  %1394 = vmatmul.mubr.f32.vlgmr.msra.gmra.mxu1 %v1715_v12  ;;  %v1125_v36 = vsub.s32 %v1122_v28, %v1890_v29 }
  0x44   :  { %1401 = vmatpush3.msra.mxu0 %v1721_v14  ;;  %1407 = vmatprep.subr.mxu1 %v1643_v0 }
  0x45   :  { %1402 = vmatprep.subr.mxu0 %v1643_v0  ;;  %1408 = vmatpush3.msra.mxu1 %v1701_v4 }
  0x46   :  { %1403 = vmatpush3.msra.mxu0 %v1725_v15  ;;  %1404 = vmatprep.mubr.msk.f32.mxu0 %vm1644_vm0, %v1643_v0 }
  0x47   :  { %1409 = vmatprep.subr.mxu1 %v1643_v0  ;;  %1418 = vmatprep.subr.mxu0 %v1643_v0 }
  0x48   :  { %1405 = vmatmul.mubr.f32.vlgmr.msra.gmra.mxu0 %v1729_v17  ;;  %1410 = vmatpush3.msra.mxu1 %v1703_v5  ;;  %v1306_v17 = vld [vmem:[%s1925_s4] ss:$0 sm:$0xff] }
  0x49   :  { %1419 = vmatpush3.msra.mxu0 %v204_v16  ;;  %1411 = vmatprep.subr.mxu1 %v1643_v0 }
  0x4a   :  { %1420 = vmatprep.subr.mxu0 %v1643_v0  ;;  %1412 = vmatpush3.msra.mxu1 %v1705_v6 }
  0x4b   :  { %1421 = vmatpush3.msra.mxu0 %v211_v18  ;;  %1413 = vmatprep.subr.mxu1 %v1643_v0 }
  0x4c   :  { %1422 = vmatprep.subr.mxu0 %v1643_v0  ;;  %1414 = vmatpush3.msra.mxu1 %v1709_v9 }
  0x4d   :  { %1415 = vmatprep.mubr.msk.f32.mxu1 %vm1644_vm0, %v1643_v0  ;;  %1423 = vmatpush3.msra.mxu0 %v218_v19 }
  0x4e   :  { %1416 = vmatmul.mubr.f32.vlgmr.msra.gmra.mxu1 %v169_v22  ;;  %1424 = vmatprep.subr.mxu0 %v1643_v0 }
  0x4f   :  { %1429 = vmatprep.subr.mxu1 %v1643_v0  ;;  %1425 = vmatpush3.msra.mxu0 %v225_v20 }
  0x50   :  { %1426 = vmatprep.mubr.msk.f32.mxu0 %vm1644_vm0, %v1643_v0  ;;  %1430 = vmatpush3.msra.mxu1 %v1701_v4  ;;  %v729_v4 = vsub.f32 %v727_v55, %v728_v61 }
  0x51   :  { %1427 = vmatmul.mubr.f32.vlgmr.msra.gmra.mxu0 %v1715_v12  ;;  %1431 = vmatprep.subr.mxu1 %v1643_v0 }
  0x52   :  { %1440 = vmatprep.subr.mxu0 %v1766_v37  ;;  %1432 = vmatpush3.msra.mxu1 %v1703_v5  ;;  %v723_v5 = vand.u32 4294901760, %v722_v63 }
  0x53   :  { %1441 = vmatpush3.msra.mxu0 %v1766_v37  ;;  %1433 = vmatprep.subr.mxu1 %v1643_v0 }
  0x54   :  { %1442 = vmatprep.subr.mxu0 %v1775_v39  ;;  %1434 = vmatpush3.msra.mxu1 %v1705_v6 }
  0x55   :  { %1443 = vmatpush3.msra.mxu0 %v1775_v39  ;;  %1435 = vmatprep.subr.mxu1 %v1643_v0 }
  0x56   :  { %1444 = vmatprep.subr.mxu0 %v1789_v45  ;;  %1436 = vmatpush3.msra.mxu1 %v1709_v9 }
  0x57   :  { %1437 = vmatprep.mubr.msk.f32.mxu1 %vm1644_vm0, %v1643_v0  ;;  %1445 = vmatpush3.msra.mxu0 %v1789_v45  ;;  %v730_v0 = vand.u32 4294901760, %v729_v4 }
  0x58   :  { %1438 = vmatmul.mubr.f32.vlgmr.msra.gmra.mxu1 %v1715_v12  ;;  %1446 = vmatprep.subr.mxu0 %v1798_v48 }
  0x59   :  { %1451 = vmatprep.subr.mxu1 %v709_v62  ;;  %1447 = vmatpush3.msra.mxu0 %v1798_v48 }
  0x5a   :  { %1452 = vmatpush3.msra.mxu1 %v709_v62  ;;  %1448 = vmatprep.mubr.f32.mxu0 %v664_v1 }
  0x5b   :  { %1453 = vmatprep.subr.mxu1 %v716_v2  ;;  %1462 = vmatprep.subr.mxu0 %v1785_v44 }
  0x5c   :  { %1449 = vmatmul.mubr.f32.vlgmr.msra.gmra.mxu0 %v674_v3  ;;  %1454 = vmatpush3.msra.mxu1 %v716_v2 }
  0x5d   :  { %1463 = vmatpush3.msra.mxu0 %v1785_v44  ;;  %1455 = vmatprep.subr.mxu1 %v723_v5 }
  0x5e   :  { %1464 = vmatprep.subr.mxu0 %v713_v47  ;;  %1456 = vmatpush3.msra.mxu1 %v723_v5 }
  0x5f   :  { %1465 = vmatpush3.msra.mxu0 %v713_v47  ;;  %1457 = vmatprep.subr.mxu1 %v730_v0 }
  0x60   :  { %1466 = vmatprep.subr.mxu0 %v720_v51  ;;  %1458 = vmatpush3.msra.mxu1 %v730_v0 }
  0x61   :  { %1459 = vmatprep.mubr.f32.mxu1 %v1777_v41  ;;  %1467 = vmatpush3.msra.mxu0 %v720_v51 }
  0x62   :  { %1460 = vmatmul.mubr.f32.vlgmr.msra.gmra.mxu1 %v1781_v42  ;;  %1468 = vmatprep.subr.mxu0 %v727_v55 }
  0x63   :  { %1473 = vmatprep.subr.mxu1 %v1766_v37  ;;  %1469 = vmatpush3.msra.mxu0 %v727_v55  ;;  %v1894_v55 = vsub.s32 0, %v1890_v29 }
  0x64   :  { %1470 = vmatprep.mubr.f32.mxu0 %v1793_v46  ;;  %1474 = vmatpush3.msra.mxu1 %v1766_v37 }
  0x65   :  { %1471 = vmatmul.mubr.f32.vlgmr.msra.gmra.mxu0 %v1801_v49  ;;  %1475 = vmatprep.subr.mxu1 %v1775_v39 }
  0x66   :  { %1484 = vmatprep.subr.mxu0 %v1807_v50  ;;  %1476 = vmatpush3.msra.mxu1 %v1775_v39 }
  0x67   :  { %1485 = vmatpush3.msra.mxu0 %v1807_v50  ;;  %1477 = vmatprep.subr.mxu1 %v1789_v45 }
  0x68   :  { %1486 = vmatprep.subr.mxu0 %v1817_v53  ;;  %1478 = vmatpush3.msra.mxu1 %v1789_v45 }
  0x69   :  { %1487 = vmatpush3.msra.mxu0 %v1817_v53  ;;  %1479 = vmatprep.subr.mxu1 %v1798_v48 }
  0x6a   :  { %1488 = vmatprep.subr.mxu0 %v721_v57  ;;  %1480 = vmatpush3.msra.mxu1 %v1798_v48 }
  0x6b   :  { %1481 = vmatprep.mubr.f32.mxu1 %v662_v52  ;;  %1489 = vmatpush3.msra.mxu0 %v721_v57 }
  0x6c   :  { %1482 = vmatmul.mubr.f32.vlgmr.msra.gmra.mxu1 %v672_v54  ;;  %1490 = vmatprep.subr.mxu0 %v728_v61 }
  0x6d   :  { %1495 = vmatprep.subr.mxu1 %v1766_v37  ;;  %1491 = vmatpush3.msra.mxu0 %v728_v61 }
  0x6e   :  { %1492 = vmatprep.mubr.f32.mxu0 %v1777_v41  ;;  %1496 = vmatpush3.msra.mxu1 %v1766_v37 }
  0x6f   :  { %1493 = vmatmul.mubr.f32.vlgmr.msra.gmra.mxu0 %v1781_v42  ;;  %1497 = vmatprep.subr.mxu1 %v1775_v39 }
  0x70   :  { %1503 = vmatprep.mubr.f32.mxu1 %v1777_v41  ;;  %1498 = vmatpush3.msra.mxu1 %v1775_v39 }
  0x71   :  { %1499 = vmatprep.subr.mxu1 %v1789_v45 }
  0x72   :  { %1500 = vmatpush3.msra.mxu1 %v1789_v45 }
  0x73   :  { %1501 = vmatprep.subr.mxu1 %v1798_v48 }
  0x74   :  { %1502 = vmatpush3.msra.mxu1 %v1798_v48 }
  0x75   :  { %1504 = vmatmul.mubr.f32.vlgmr.msra.gmra.mxu1 %v1781_v42 }
  0xff   :  { %v173_v6 = vpop.f32.mrf.mxu0 }
 0x100   :  { %v174_v18 = vadd.f32 %v1306_v17, %v173_v6  ;;  %v1181_v17 = vand.u32 127, %v1123_v25 }
 0x101   :  { %v1384_v7 = vpop.f32.mrf.mxu0 }
 0x103   :  { %v264_v9 = vpop.f32.mrf.mxu1 }
 0x104   :  { %v265_v21 = vadd.f32 %v264_v9, %v174_v18 }
 0x105   :  { %v1395_v10 = vpop.f32.mrf.mxu1 }
 0x108   :  { %v344_v11 = vpop.f32.mrf.mxu0 }
 0x109   :  { %v345_v22 = vadd.f32 %v344_v11, %v265_v21 }
 0x10a   :  { %v1406_v12 = vpop.f32.mrf.mxu0 }
 0x10b   :  { %v1307_v12 = vld [vmem:[%s1926_s5] ss:$0 sm:$0xff]  ;;  %s1647_s5 = smov [#allocation10]  }
 0x10c   :  { %s1295_s18 = sshll.u32 %s1647_s5, 4  ;;  %s1296_s18 = int_to_ptr.vmem [resolvable:$true] %s1295_s18 }
 0x10d   :  { %s1609_s19 = scalar_lea.vmem %s1296_s18, 32  ;;  %p1614_p7 = scmp.lt.s32.totalorder %s1296_s18, %s1296_s18 }
 0x10e   :  { %v421_v13 = vpop.f32.mrf.mxu1  ;;  %p1610_p6 = scmp.ne.s32.totalorder %s1296_s18, %s1609_s19  ;;  %p1615_p8 = scmp.lt.s32.totalorder %s1609_s19, %s1609_s19 }
 0x10f   :  { %v422_v26 = vadd.f32 %v421_v13, %v345_v22 }
 0x110   :  { %v1417_v14 = vpop.f32.mrf.mxu1  ;;  %p1616_p9 = por %p1615_p8, %p1614_p7 }
 0x111   :  { %v504_v15 = vpop.f32.mrf.mxu0 }
 0x112   :  { %v505_v30 = vadd.f32 %v504_v15, %v422_v26  ;;  %v1646_v26 = vmov 0   ;;  %p1617_p10 = pnand %p1616_p9, %p1610_p6 }
 0x113   :  { %v1428_v16 = vpop.f32.mrf.mxu0  ;;  %1518 = vset.pattern.permute.xlu0 %v1646_v26  ;;  %1517 = vset.pattern.permute.xlu1 %v1646_v26 }
 0x118   :  { %v579_v19 = vpop.f32.mrf.mxu1 }
 0x119   :  { %v580_v35 = vadd.f32 %v579_v19, %v505_v30  ;;  %v1184_v19 = vsub.s32 %v1181_v17, %v1890_v29 }
 0x11a   :  { %v1439_v20 = vpop.f32.mrf.mxu1 }
 0x11b   :  { %v1126_v39 = vrot.slane %v580_v35, %v1125_v36 }
 0x11c   :  { %v1450_v27 = vpop.f32.mrf.mxu0 }
 0x11d   :  { %v1127_v44 = vcombine.high %v1126_v39, %v1126_v39  ;;  %v1134_v53 = vrot.slane %v1126_v39, %v1125_v36 }
 0x11e   :  { %v666_v31 = vpop.f32.mrf.mxu0 }
 0x11f   :  { %v1141_v51 = vrot.slane %v1127_v44, %v1125_v36  ;;  %v1145_v63 = vrot.slane %v1134_v53, %v1894_v55 }
 0x121   :  { %v1149_v59 = vrot.slane %v1141_v51, %v1894_v55 }
 0x122   :  { %v1461_v33 = vpop.f32.mrf.mxu1 }
 0x123   :  { %v774_v40 = vadd.f32 %v1461_v33, %v1450_v27  ;;  %v1204_v27 = vsub.s32 1, %v1890_v29 }
 0x124   :  { %v767_v37 = vpop.f32.mrf.mxu1 }
 0x125   :  { %v1472_v38 = vpop.f32.mrf.mxu0  ;;  %v768_v42 = vadd.f32 %v767_v37, %v666_v31 }
 0x126   :  { %v861_v45 = vadd.f32 %v1472_v38, %v774_v40 }
 0x127   :  { %v853_v43 = vpop.f32.mrf.mxu0 }
 0x128   :  { %v854_v48 = vadd.f32 %v853_v43, %v768_v42 }
 0x12c   :  { %v1483_v41 = vpop.f32.mrf.mxu1 }
 0x12d   :  { %v946_v49 = vadd.f32 %v1483_v41, %v861_v45 }
 0x12e   :  { %v937_v46 = vpop.f32.mrf.mxu1 }
 0x12f   :  { %v1494_v47 = vpop.f32.mrf.mxu0  ;;  %v938_v50 = vadd.f32 %v937_v46, %v854_v48 }
 0x130   :  { %v1035_v54 = vadd.f32 %v1494_v47, %v946_v49 }
 0x131   :  { %v1028_v52 = vpop.f32.mrf.mxu0 }
 0x132   :  { %v1029_v57 = vadd.f32 %v1028_v52, %v938_v50 }
 0x135   :  { %v1505_v56 = vpop.f32.mrf.mxu1 }
 0x136   :  { %v1116_v58 = vadd.f32 %v1505_v56, %v1035_v54 }
 0x137   :  { %v1109_v60 = vpop.f32.mrf.mxu1 }
 0x138   :  { %v1153_v61 = vadd.f32 %v1149_v59, %v1116_v58  ;;  %v1110_v62 = vadd.f32 %v1109_v60, %v1029_v57 }
 0x13a   :  { %v1157_v1 = vmul.f32 0.70710677, %v1153_v61  ;;  %v1152_v2 = vadd.f32 %v1145_v63, %v1110_v62  ;;  %v1155_v6 = vmul.f32 0.5, %v1153_v61 }
 0x13c   :  { %1519 = verf.f32 %v1157_v1  ;;  %v1156_v3 = vmul.f32 0.70710677, %v1152_v2  ;;  %v1154_v7 = vmul.f32 0.5, %v1152_v2  ;;  %v1277_v1 = vrot.slane %v1707_v8, 1 }
 0x13e   :  { %1521 = verf.f32 %v1156_v3 }
 0x149   :  { %v1520_v4 = vpop.eup %1519 }
 0x14a   :  { %v1161_v5 = vadd.f32 1.0, %v1520_v4 }
 0x14b   :  { %v1522_v0 = vpop.eup %1521 }
 0x14c   :  { %v1160_v9 = vadd.f32 1.0, %v1522_v0  ;;  %v1163_v11 = vmul.f32 %v1161_v5, %v1155_v6 }
 0x14e   :  { %v1162_v10 = vmul.f32 %v1160_v9, %v1154_v7  ;;  %v1171_v15 = vmul.f32 %v1307_v12, %v1163_v11 }
 0x150   :  { %v1170_v13 = vmul.f32 %v1307_v12, %v1162_v10  ;;  %v1175_v16 = vsel %vm94_vm1, %v1171_v15, 0.0 }
 0x152   :  { %v1172_v14 = vsel %vm94_vm1, %v1170_v13, 0.0 }
 0x153   :  { %1173 = vadd.xlane.f32.xlu0 %v1172_v14 }
 0x157   :  { %1176 = vadd.xlane.f32.xlu0 %v1175_v16 }
 0x1dc   :  { %v1174_v18 = vpop.xlane.xlu0 %1173 }
 0x1dd   :  { %v1185_v21 = vrot.slane %v1174_v18, %v1184_v19 }
 0x1e0   :  { %v1177_v20 = vpop.xlane.xlu0 %1176 }
 0x1e1   :  { %v1189_v22 = vrot.slane %v1177_v20, %v1184_v19 }
 0x1e3   :  { %v1191_v23 = vsel %vm1190_vm2, %v1189_v22, %v1185_v21 }
 0x1e4   :  { %v1194_v24 = vsel %vm1193_vm3, %v1191_v23, -inf }
 0x1e5   :  { %1195 = vmax.xlane.f32.xlu1 %v1194_v24 }
 0x26e   :  { %v1196_v28 = vpop.xlane.xlu1 %1195 }
 0x26f   :  { %v1201_v25 = vrot.slane %v1196_v28, %v1894_v55  ;;  %v1205_v30 = vrot.slane %v1196_v28, %v1204_v27 }
 0x271   :  { %v1208_v31 = vsub.f32 %v1174_v18, %v1201_v25  ;;  %v1209_v33 = vsub.f32 %v1177_v20, %v1205_v30 }
 0x273   :  { %v1210_v35 = vmul.f32 1.442695, %v1208_v31  ;;  %v1212_v36 = vmul.f32 1.442695, %v1209_v33 }
 0x275   :  { %1523 = vpow2.f32 %v1210_v35 }
 0x276   :  { %1525 = vpow2.f32 %v1212_v36 }
 0x282   :  { %v1524_v37 = vpop.eup %1523 }
 0x283   :  { %v1526_v38 = vpop.eup %1525  ;;  %1217 = vperm.xlu1 %1517, %v1524_v37  }
 0x284   :  { %1220 = vperm.xlu0 %1518, %v1526_v38  }
 0x2fe   :  { %v1218_v39 = vpop.permute.xlu1 %1217 }
 0x2ff   :  { %v1221_v40 = vpop.permute.xlu0 %1220  ;;  %v1225_v41 = vrot.slane %v1218_v39, %v1184_v19 }
 0x300   :  { %v1229_v42 = vrot.slane %v1221_v40, %v1184_v19 }
 0x302   :  { %v1230_v29 = vsel %vm1190_vm2, %v1229_v42, %v1225_v41 }
 0x303   :  { %v1232_v43 = vsel %vm1193_vm3, %v1230_v29, 0.0 }
 0x304   :  { %1233 = vadd.xlane.f32.xlu1 %v1232_v43 }
 0x38d   :  { %v1234_v44 = vpop.xlane.xlu1 %1233 }
 0x38e   :  { %1527 = vrcp.f32 %v1234_v44 }
 0x39b   :  { %v1528_v45 = vpop.eup %1527 }
 0x39c   :  { %v1244_v46 = vrot.slane %v1528_v45, %v1204_v27  ;;  %v1240_v48 = vrot.slane %v1528_v45, %v1894_v55 }
 0x39e   :  { %v1248_v47 = vmul.f32 %v1526_v38, %v1244_v46  ;;  %v1247_v49 = vmul.f32 %v1524_v37, %v1240_v48 }
 0x3a0   :  { %1256 = vperm.xlu0 %1518, %v1248_v47  }
 0x3a4   :  { %1251 = vperm.xlu0 %1518, %v1247_v49  }
 0x41b   :  { %v1257_v50 = vpop.permute.xlu0 %1256 }
 0x41c   :  { %v1260_v51 = vmul.f32 %v1257_v50, %v1757_v34 }
 0x41e   :  { %v1268_v52 = vsel %vm94_vm1, %v1260_v51, 0.0 }
 0x41f   :  { %v1269_v53 = vrot.slane %v1268_v52, 4  ;;  %v1252_v54 = vpop.permute.xlu0 %1251 }
 0x420   :  { %v1259_v56 = vmul.f32 %v1252_v54, %v1753_v32 }
 0x421   :  { %v1270_v57 = vadd.f32 %v1269_v53, %v1268_v52 }
 0x422   :  { %v1261_v58 = vsel %vm94_vm1, %v1259_v56, 0.0 }
 0x423   :  { %v1271_v59 = vrot.slane %v1270_v57, 2  ;;  %v1262_v60 = vrot.slane %v1261_v58, 4 }
 0x425   :  { %v1272_v61 = vadd.f32 %v1271_v59, %v1270_v57  ;;  %v1263_v62 = vadd.f32 %v1262_v60, %v1261_v58 }
 0x427   :  { %v1273_v55 = vrot.slane %v1272_v61, 1  ;;  %v1264_v63 = vrot.slane %v1263_v62, 2 }
 0x429   :  { %v1274_v2 = vadd.f32 %v1273_v55, %v1272_v61  ;;  %v1265_v3 = vadd.f32 %v1264_v63, %v1263_v62 }
 0x42b   :  { %v1266_v34 = vrot.slane %v1265_v3, 1  ;;  %v1281_v4 = vadd.f32 %v1277_v1, %v1274_v2 }
 0x42d   :  { %v1267_v5 = vadd.f32 %v1266_v34, %v1265_v3  ;;  %v1284_v0 = vrot.slane %v1281_v4, 7 }
 0x42f   :  { %v1280_v32 = vadd.f32 %v1267_v5, %v1707_v8 }
 0x431   :  { %v1285_v6 = vsel %vm1190_vm2, %v1284_v0, %v1280_v32 }
 0x432   :  { %1288 = vst.msk [vmem:[#allocation10] sm:$0x3] %vm1287_vm4, %v1285_v6 }
 0x433   :  { %1620 = shalt.err (!%p1617_p10)
}
 0x434   :  { %1298 = dma.vmem_to_hbm [thread:$0]  %s1296_s18, 32, %s1927_s6, [#allocation4]  }
 0x435   :  { %1635 = dma.done.wait [#allocation4], 32  }
 0x436   :  { %1636 = vsyncadd [#allocation4], 4294967264 }
 0x437   :  { %1302 = vsyncpa [#allocation3], 1 }
 0x438   :  { %1303 = vsyncpa [#allocation6], 1 }
 0x439   :  { %1304 = vsyncpa [#allocation9], 1 }
 0x43a   :  { %1305 = vsyncpa [#allocation4], 1 }

</bundles_post_ra>
